<compile_context>
chip_gen: v7x
topology: tpu7x:2x2x1
jax: 0.10.0
libtpu: 0.0.40
codegen_flags: <defaults>
</compile_context>

<pallas_src>
import functools

import jax
import jax.numpy as jnp
from jax.experimental import pallas as pl
from jax.experimental.pallas import tpu as pltpu


def _slab_layout(H, W, T):
    """Row offsets (8-aligned) and lane width for the packed weight slab."""
    lanes = ((max(4 * H, T) + 127) // 128) * 128
    blocks = [("wih0", W, 4 * H), ("whh0", H, 4 * H), ("b0", 1, 4 * H),
              ("wih1", H, 4 * H), ("whh1", H, 4 * H), ("b1", 1, 4 * H),
              ("w1t", H, T), ("hb", 1, T)]
    offs, row = {}, 0
    for name, nrows, ncols in blocks:
        offs[name] = (row, nrows, ncols)
        row += ((nrows + 7) // 8) * 8          # keep every block sublane-aligned
    return offs, row, lanes


def lstm_wavelet_kernel(x_ref, w_ref, w2_ref, out_ref, xproj_ref,
                        *, H, S, Bp, B, T, offs):
    """x_ref:(S*Bp,W) time-major; w_ref: packed weight slab; w2_ref:(S,) SMEM;
    out_ref:(B,T); xproj_ref:(S*Bp,4H) VMEM scratch."""

    def blk(name):
        r0, nrows, ncols = offs[name]
        return w_ref[r0:r0 + nrows, :ncols]      # static, 8-aligned slice (free)

    wih0, whh0, b0 = blk("wih0"), blk("whh0"), blk("b0")
    wih1, whh1, b1 = blk("wih1"), blk("whh1"), blk("b1")

    # Hoisted layer-0 input projection for all timesteps (one big MXU push),
    # spilled to VMEM scratch to keep vreg pressure low through the unrolled loop.
    xproj_ref[...] = (
        jnp.dot(x_ref[...], wih0, preferred_element_type=jnp.float32) + b0)

    def act(gates):
        # Gate columns permuted offline to (i, f, o, g): one sigmoid slab + one tanh.
        sig = jax.nn.sigmoid(gates[:, :3 * H])
        g = jnp.tanh(gates[:, 3 * H:])
        return sig[:, :H], sig[:, H:2 * H], sig[:, 2 * H:3 * H], g

    z = jnp.zeros((Bp, H), jnp.float32)
    h0, c0, h1, c1, acc = z, z, z, z, z

    # Fully unrolled recurrence (S is small & static).
    for t in range(S):
        # Both recurrent matmuls depend only on previous-step state: issue them
        # back-to-back so the whh1 push overlaps with layer-0's activations.
        r0 = jnp.dot(h0, whh0, preferred_element_type=jnp.float32)
        r1 = jnp.dot(h1, whh1, preferred_element_type=jnp.float32)

        # Layer 0 (input part + bias already in xproj; Bp-aligned slice).
        gates0 = xproj_ref[t * Bp:(t + 1) * Bp, :] + r0
        i0, f0, o0, g0 = act(gates0)
        c0 = f0 * c0 + i0 * g0
        h0 = o0 * jnp.tanh(c0)

        # Layer 1.
        gates1 = jnp.dot(h0, wih1, preferred_element_type=jnp.float32) + r1 + b1
        i1, f1, o1, g1 = act(gates1)
        c1 = f1 * c1 + i1 * g1
        h1 = o1 * jnp.tanh(c1)

        # Head accumulation: sum_t w2[t] * lstm_out[t] (linear1 commutes with it).
        acc = acc + w2_ref[t] * h1

    # Head: linear1 on the accumulated state, folded bias, log_softmax over targets.
    shrunk = jnp.dot(acc, blk("w1t"), preferred_element_type=jnp.float32) + blk("hb")
    m = jnp.max(shrunk, axis=1, keepdims=True)
    zc = shrunk - m
    lse = jnp.log(jnp.sum(jnp.exp(zc), axis=1, keepdims=True))
    out_ref[...] = (zc - lse)[:B, :]             # only the real batch rows


def prepare_params(p):
    """One-time parameter packing (NOT per forward call):
    gate reorder (i,f,g,o)->(i,f,o,g), head-bias fold, single 128-lane slab."""
    H = p["whh0_t"].shape[0]
    W = p["wih0_t"].shape[0]
    T = p["w1_t"].shape[1]
    offs, total_rows, lanes = _slab_layout(H, W, T)

    def perm(w):
        return jnp.concatenate(
            [w[..., :2 * H], w[..., 3 * H:4 * H], w[..., 2 * H:3 * H]], axis=-1)

    w2 = p["w2"][:, 0].astype(jnp.float32)                       # (S,)
    head_bias = (p["b_lin1"] * jnp.sum(w2) + p["b2"][0]).reshape(1, T)

    mats = {"wih0": perm(p["wih0_t"]), "whh0": perm(p["whh0_t"]), "b0": perm(p["b0"]),
            "wih1": perm(p["wih1_t"]), "whh1": perm(p["whh1_t"]), "b1": perm(p["b1"]),
            "w1t": p["w1_t"], "hb": head_bias}

    slab = jnp.zeros((total_rows, lanes), jnp.float32)
    for name, (r0, nrows, ncols) in offs.items():
        slab = slab.at[r0:r0 + nrows, :ncols].set(mats[name].astype(jnp.float32))
    return slab, w2


def make_forward(hidden_dim, wavelet_dim, sequence_dim, target_dim, batch=10):
    H, W, S, T, B = hidden_dim, wavelet_dim, sequence_dim, target_dim, batch
    Bp = ((B + 7) // 8) * 8                       # pad batch to a sublane multiple
    offs, total_rows, lanes = _slab_layout(H, W, T)

    kernel = functools.partial(
        lstm_wavelet_kernel, H=H, S=S, Bp=Bp, B=B, T=T, offs=offs)

    vmem = pl.BlockSpec(memory_space=pltpu.MemorySpace.VMEM)
    smem = pl.BlockSpec(memory_space=pltpu.MemorySpace.SMEM)

    call = pl.pallas_call(
        kernel,
        out_shape=jax.ShapeDtypeStruct((B, T), jnp.float32),
        in_specs=[vmem, vmem, smem],              # x, packed weight slab, w2
        out_specs=vmem,
        scratch_shapes=[pltpu.VMEM((S * Bp, 4 * H), jnp.float32)],
    )

    @jax.jit
    def forward(wavelet, slab, w2):
        # Layout plumbing only: time-major + pad batch to Bp for aligned slices.
        x = jnp.transpose(wavelet.astype(jnp.float32), (1, 0, 2))   # (S, B, W)
        x = jnp.pad(x, ((0, 0), (0, Bp - B), (0, 0)))               # (S, Bp, W)
        return call(x.reshape(S * Bp, W), slab, w2)

    return forward


def make_params(key, hidden_dim, wavelet_dim, sequence_dim, target_dim):
    """Deterministic synthetic parameters (PyTorch-style uniform init), gate order i,f,g,o."""
    H, W, S, T = hidden_dim, wavelet_dim, sequence_dim, target_dim
    ks = jax.random.split(key, 12)
    s = 1.0 / jnp.sqrt(H)

    def u(k, shape, scale):
        return jax.random.uniform(k, shape, jnp.float32, -scale, scale)

    wih0_t = u(ks[0], (W, 4 * H), s)
    whh0_t = u(ks[1], (H, 4 * H), s)
    b0 = u(ks[2], (1, 4 * H), s) + u(ks[3], (1, 4 * H), s)       # b_ih + b_hh
    wih1_t = u(ks[4], (H, 4 * H), s)
    whh1_t = u(ks[5], (H, 4 * H), s)
    b1 = u(ks[6], (1, 4 * H), s) + u(ks[7], (1, 4 * H), s)
    w1_t = u(ks[8], (H, T), 1.0 / jnp.sqrt(H))
    b_lin1 = u(ks[9], (1, T), 1.0 / jnp.sqrt(H))
    w2 = u(ks[10], (S, 1), 1.0 / jnp.sqrt(S))
    b2 = u(ks[11], (1,), 1.0 / jnp.sqrt(S))
    return dict(wih0_t=wih0_t, whh0_t=whh0_t, b0=b0,
                wih1_t=wih1_t, whh1_t=whh1_t, b1=b1,
                w1_t=w1_t, b_lin1=b_lin1, w2=w2, b2=b2)


def reference_forward(wavelet, p):
    """Pure-JAX reference mirroring the PyTorch forward (gate order i,f,g,o)."""
    B, S, W = wavelet.shape
    H = p["whh0_t"].shape[0]
    h0 = c0 = h1 = c1 = jnp.zeros((B, H), jnp.float32)
    outs = []

    def cell(x_t, h, c, wih, whh, b):
        g = x_t @ wih + h @ whh + b
        i = jax.nn.sigmoid(g[:, :H]); f = jax.nn.sigmoid(g[:, H:2 * H])
        gg = jnp.tanh(g[:, 2 * H:3 * H]); o = jax.nn.sigmoid(g[:, 3 * H:])
        c = f * c + i * gg
        return o * jnp.tanh(c), c

    for t in range(S):
        x_t = wavelet[:, t, :]
        h0, c0 = cell(x_t, h0, c0, p["wih0_t"], p["whh0_t"], p["b0"])
        h1, c1 = cell(h0, h1, c1, p["wih1_t"], p["whh1_t"], p["b1"])
        outs.append(h1)
    lstm_out = jnp.stack(outs, axis=1)                      # (B, S, H)
    cand = lstm_out @ p["w1_t"] + p["b_lin1"]               # (B, S, T)
    shrunk = jnp.einsum("bst,s->bt", cand, p["w2"][:, 0]) + p["b2"][0]
    return jax.nn.log_softmax(shrunk, axis=1)


if __name__ == "__main__":
    HIDDEN_DIM = 32
    WAVELET_DIM = 16
    SEQUENCE_DIM = 8
    TARGET_DIM = 16
    BATCH = 10   # fixed by init_hidden() / .view(10, -1) in the PyTorch module

    key = jax.random.PRNGKey(0)
    k_x, k_p = jax.random.split(key)
    wavelet = jax.random.normal(k_x, (BATCH, SEQUENCE_DIM, WAVELET_DIM), jnp.float32)
    params = make_params(k_p, HIDDEN_DIM, WAVELET_DIM, SEQUENCE_DIM, TARGET_DIM)

    slab, w2 = prepare_params(params)        # one-time weight packing
    forward = make_forward(HIDDEN_DIM, WAVELET_DIM, SEQUENCE_DIM, TARGET_DIM, BATCH)

    result = jax.block_until_ready(forward(wavelet, slab, w2))
    ref = jax.block_until_ready(reference_forward(wavelet, params))

    assert result.shape == (BATCH, TARGET_DIM)
    assert bool(jnp.all(jnp.isfinite(result)))
    assert bool(jnp.allclose(result, ref, rtol=1e-4, atol=1e-4)), (
        f"max abs diff {float(jnp.max(jnp.abs(result - ref)))}")
    print("KERNEL_OK")
</pallas_src>

<mosaic_0001>
module attributes {stable_mosaic.version = 11 : i64} {
  func.func @lstm_wavelet_kernel(%arg0: memref<128x16xf32, #tpu.memory_space<vmem>>, %arg1: memref<168x128xf32, #tpu.memory_space<vmem>>, %arg2: memref<8xf32, #tpu.memory_space<smem>>, %arg3: memref<10x16xf32, #tpu.memory_space<vmem>>, %arg4: memref<128x128xf32, #tpu.memory_space<vmem>>) attributes {dimension_semantics = [], scalar_prefetch = 0 : i64, scratch_operands = 1 : i64, tpu.core_type = #tpu.core_type<tc>} {
    %c0 = arith.constant 0 : index
    %c0_0 = arith.constant 0 : index
    %0 = vector.load %arg1[%c0, %c0_0] : memref<168x128xf32, #tpu.memory_space<vmem>>, vector<16x128xf32>
    %c16 = arith.constant 16 : index
    %c0_1 = arith.constant 0 : index
    %1 = vector.load %arg1[%c16, %c0_1] : memref<168x128xf32, #tpu.memory_space<vmem>>, vector<32x128xf32>
    %c48 = arith.constant 48 : index
    %c0_2 = arith.constant 0 : index
    %2 = vector.load %arg1[%c48, %c0_2] : memref<168x128xf32, #tpu.memory_space<vmem>>, vector<1x128xf32>
    %c56 = arith.constant 56 : index
    %c0_3 = arith.constant 0 : index
    %3 = vector.load %arg1[%c56, %c0_3] : memref<168x128xf32, #tpu.memory_space<vmem>>, vector<32x128xf32>
    %c88 = arith.constant 88 : index
    %c0_4 = arith.constant 0 : index
    %4 = vector.load %arg1[%c88, %c0_4] : memref<168x128xf32, #tpu.memory_space<vmem>>, vector<32x128xf32>
    %c120 = arith.constant 120 : index
    %c0_5 = arith.constant 0 : index
    %5 = vector.load %arg1[%c120, %c0_5] : memref<168x128xf32, #tpu.memory_space<vmem>>, vector<1x128xf32>
    %c0_6 = arith.constant 0 : index
    %c0_7 = arith.constant 0 : index
    %6 = vector.load %arg0[%c0_6, %c0_7] : memref<128x16xf32, #tpu.memory_space<vmem>>, vector<128x16xf32>
    %cst = arith.constant dense<0.000000e+00> : vector<128x128xf32>
    %7 = tpu.matmul %6, %0, %cst {dimension_numbers = #tpu.dot_dimension_numbers<[1], [0], [0], [1], [0, 0, 1, 1], [], []>} : vector<128x16xf32>, vector<16x128xf32>, vector<128x128xf32> -> vector<128x128xf32>
    %8 = vector.broadcast %2 : vector<1x128xf32> to vector<128x128xf32>
    %9 = arith.addf %7, %8 : vector<128x128xf32>
    %c0_8 = arith.constant 0 : index
    %c0_9 = arith.constant 0 : index
    %10 = vector.load %arg4[%c0_8, %c0_9] : memref<128x128xf32, #tpu.memory_space<vmem>>, vector<128x128xf32>
    tpu.vector_store %arg4[%c0_8, %c0_9], %9 {strides = array<i32>} : memref<128x128xf32, #tpu.memory_space<vmem>>, vector<128x128xf32>,
    %cst_10 = arith.constant 0.000000e+00 : f32
    %11 = vector.broadcast %cst_10 : f32 to vector<16x32xf32>
    %cst_11 = arith.constant dense<0.000000e+00> : vector<16x128xf32>
    %12 = tpu.matmul %11, %1, %cst_11 {dimension_numbers = #tpu.dot_dimension_numbers<[1], [0], [0], [1], [0, 0, 1, 1], [], []>} : vector<16x32xf32>, vector<32x128xf32>, vector<16x128xf32> -> vector<16x128xf32>
    %cst_12 = arith.constant dense<0.000000e+00> : vector<16x128xf32>
    %13 = tpu.matmul %11, %4, %cst_12 {dimension_numbers = #tpu.dot_dimension_numbers<[1], [0], [0], [1], [0, 0, 1, 1], [], []>} : vector<16x32xf32>, vector<32x128xf32>, vector<16x128xf32> -> vector<16x128xf32>
    %c0_13 = arith.constant 0 : index
    %c0_14 = arith.constant 0 : index
    %14 = vector.load %arg4[%c0_13, %c0_14] : memref<128x128xf32, #tpu.memory_space<vmem>>, vector<16x128xf32>
    %15 = arith.addf %14, %12 : vector<16x128xf32>
    %16 = vector.extract_strided_slice %15 {offsets = [0, 0], sizes = [16, 96], strides = [1, 1]} : vector<16x128xf32> to vector<16x96xf32>
    %17 = arith.negf %16 : vector<16x96xf32>
    %18 = math.exp %17 : vector<16x96xf32>
    %cst_15 = arith.constant 1.000000e+00 : f32
    %19 = vector.broadcast %cst_15 : f32 to vector<16x96xf32>
    %20 = arith.addf %19, %18 : vector<16x96xf32>
    %21 = arith.divf %19, %20 : vector<16x96xf32>
    %22 = vector.extract_strided_slice %15 {offsets = [0, 96], sizes = [16, 32], strides = [1, 1]} : vector<16x128xf32> to vector<16x32xf32>
    %23 = math.tanh %22 : vector<16x32xf32>
    %24 = vector.extract_strided_slice %21 {offsets = [0, 0], sizes = [16, 32], strides = [1, 1]} : vector<16x96xf32> to vector<16x32xf32>
    %25 = vector.extract_strided_slice %21 {offsets = [0, 32], sizes = [16, 32], strides = [1, 1]} : vector<16x96xf32> to vector<16x32xf32>
    %26 = vector.extract_strided_slice %21 {offsets = [0, 64], sizes = [16, 32], strides = [1, 1]} : vector<16x96xf32> to vector<16x32xf32>
    %27 = arith.mulf %25, %11 : vector<16x32xf32>
    %28 = arith.mulf %24, %23 : vector<16x32xf32>
    %29 = arith.addf %27, %28 : vector<16x32xf32>
    %30 = math.tanh %29 : vector<16x32xf32>
    %31 = arith.mulf %26, %30 : vector<16x32xf32>
    %cst_16 = arith.constant dense<0.000000e+00> : vector<16x128xf32>
    %32 = tpu.matmul %31, %3, %cst_16 {dimension_numbers = #tpu.dot_dimension_numbers<[1], [0], [0], [1], [0, 0, 1, 1], [], []>} : vector<16x32xf32>, vector<32x128xf32>, vector<16x128xf32> -> vector<16x128xf32>
    %33 = arith.addf %32, %13 : vector<16x128xf32>
    %34 = vector.broadcast %5 : vector<1x128xf32> to vector<16x128xf32>
    %35 = arith.addf %33, %34 : vector<16x128xf32>
    %36 = vector.extract_strided_slice %35 {offsets = [0, 0], sizes = [16, 96], strides = [1, 1]} : vector<16x128xf32> to vector<16x96xf32>
    %37 = arith.negf %36 : vector<16x96xf32>
    %38 = math.exp %37 : vector<16x96xf32>
    %cst_17 = arith.constant 1.000000e+00 : f32
    %39 = vector.broadcast %cst_17 : f32 to vector<16x96xf32>
    %40 = arith.addf %39, %38 : vector<16x96xf32>
    %41 = arith.divf %39, %40 : vector<16x96xf32>
    %42 = vector.extract_strided_slice %35 {offsets = [0, 96], sizes = [16, 32], strides = [1, 1]} : vector<16x128xf32> to vector<16x32xf32>
    %43 = math.tanh %42 : vector<16x32xf32>
    %44 = vector.extract_strided_slice %41 {offsets = [0, 0], sizes = [16, 32], strides = [1, 1]} : vector<16x96xf32> to vector<16x32xf32>
    %45 = vector.extract_strided_slice %41 {offsets = [0, 32], sizes = [16, 32], strides = [1, 1]} : vector<16x96xf32> to vector<16x32xf32>
    %46 = vector.extract_strided_slice %41 {offsets = [0, 64], sizes = [16, 32], strides = [1, 1]} : vector<16x96xf32> to vector<16x32xf32>
    %47 = arith.mulf %45, %11 : vector<16x32xf32>
    %48 = arith.mulf %44, %43 : vector<16x32xf32>
    %49 = arith.addf %47, %48 : vector<16x32xf32>
    %50 = math.tanh %49 : vector<16x32xf32>
    %51 = arith.mulf %46, %50 : vector<16x32xf32>
    %c0_18 = arith.constant 0 : index
    %52 = memref.load %arg2[%c0_18] : memref<8xf32, #tpu.memory_space<smem>>
    %53 = vector.broadcast %52 : f32 to vector<16x32xf32>
    %54 = arith.mulf %53, %51 : vector<16x32xf32>
    %55 = arith.addf %11, %54 : vector<16x32xf32>
    %cst_19 = arith.constant dense<0.000000e+00> : vector<16x128xf32>
    %56 = tpu.matmul %31, %1, %cst_19 {dimension_numbers = #tpu.dot_dimension_numbers<[1], [0], [0], [1], [0, 0, 1, 1], [], []>} : vector<16x32xf32>, vector<32x128xf32>, vector<16x128xf32> -> vector<16x128xf32>
    %cst_20 = arith.constant dense<0.000000e+00> : vector<16x128xf32>
    %57 = tpu.matmul %51, %4, %cst_20 {dimension_numbers = #tpu.dot_dimension_numbers<[1], [0], [0], [1], [0, 0, 1, 1], [], []>} : vector<16x32xf32>, vector<32x128xf32>, vector<16x128xf32> -> vector<16x128xf32>
    %c16_21 = arith.constant 16 : index
    %c0_22 = arith.constant 0 : index
    %58 = vector.load %arg4[%c16_21, %c0_22] : memref<128x128xf32, #tpu.memory_space<vmem>>, vector<16x128xf32>
    %59 = arith.addf %58, %56 : vector<16x128xf32>
    %60 = vector.extract_strided_slice %59 {offsets = [0, 0], sizes = [16, 96], strides = [1, 1]} : vector<16x128xf32> to vector<16x96xf32>
    %61 = arith.negf %60 : vector<16x96xf32>
    %62 = math.exp %61 : vector<16x96xf32>
    %cst_23 = arith.constant 1.000000e+00 : f32
    %63 = vector.broadcast %cst_23 : f32 to vector<16x96xf32>
    %64 = arith.addf %63, %62 : vector<16x96xf32>
    %65 = arith.divf %63, %64 : vector<16x96xf32>
    %66 = vector.extract_strided_slice %59 {offsets = [0, 96], sizes = [16, 32], strides = [1, 1]} : vector<16x128xf32> to vector<16x32xf32>
    %67 = math.tanh %66 : vector<16x32xf32>
    %68 = vector.extract_strided_slice %65 {offsets = [0, 0], sizes = [16, 32], strides = [1, 1]} : vector<16x96xf32> to vector<16x32xf32>
    %69 = vector.extract_strided_slice %65 {offsets = [0, 32], sizes = [16, 32], strides = [1, 1]} : vector<16x96xf32> to vector<16x32xf32>
    %70 = vector.extract_strided_slice %65 {offsets = [0, 64], sizes = [16, 32], strides = [1, 1]} : vector<16x96xf32> to vector<16x32xf32>
    %71 = arith.mulf %69, %29 : vector<16x32xf32>
    %72 = arith.mulf %68, %67 : vector<16x32xf32>
    %73 = arith.addf %71, %72 : vector<16x32xf32>
    %74 = math.tanh %73 : vector<16x32xf32>
    %75 = arith.mulf %70, %74 : vector<16x32xf32>
    %cst_24 = arith.constant dense<0.000000e+00> : vector<16x128xf32>
    %76 = tpu.matmul %75, %3, %cst_24 {dimension_numbers = #tpu.dot_dimension_numbers<[1], [0], [0], [1], [0, 0, 1, 1], [], []>} : vector<16x32xf32>, vector<32x128xf32>, vector<16x128xf32> -> vector<16x128xf32>
    %77 = arith.addf %76, %57 : vector<16x128xf32>
    %78 = vector.broadcast %5 : vector<1x128xf32> to vector<16x128xf32>
    %79 = arith.addf %77, %78 : vector<16x128xf32>
    %80 = vector.extract_strided_slice %79 {offsets = [0, 0], sizes = [16, 96], strides = [1, 1]} : vector<16x128xf32> to vector<16x96xf32>
    %81 = arith.negf %80 : vector<16x96xf32>
    %82 = math.exp %81 : vector<16x96xf32>
    %cst_25 = arith.constant 1.000000e+00 : f32
    %83 = vector.broadcast %cst_25 : f32 to vector<16x96xf32>
    %84 = arith.addf %83, %82 : vector<16x96xf32>
    %85 = arith.divf %83, %84 : vector<16x96xf32>
    %86 = vector.extract_strided_slice %79 {offsets = [0, 96], sizes = [16, 32], strides = [1, 1]} : vector<16x128xf32> to vector<16x32xf32>
    %87 = math.tanh %86 : vector<16x32xf32>
    %88 = vector.extract_strided_slice %85 {offsets = [0, 0], sizes = [16, 32], strides = [1, 1]} : vector<16x96xf32> to vector<16x32xf32>
    %89 = vector.extract_strided_slice %85 {offsets = [0, 32], sizes = [16, 32], strides = [1, 1]} : vector<16x96xf32> to vector<16x32xf32>
    %90 = vector.extract_strided_slice %85 {offsets = [0, 64], sizes = [16, 32], strides = [1, 1]} : vector<16x96xf32> to vector<16x32xf32>
    %91 = arith.mulf %89, %49 : vector<16x32xf32>
    %92 = arith.mulf %88, %87 : vector<16x32xf32>
    %93 = arith.addf %91, %92 : vector<16x32xf32>
    %94 = math.tanh %93 : vector<16x32xf32>
    %95 = arith.mulf %90, %94 : vector<16x32xf32>
    %c1 = arith.constant 1 : index
    %96 = memref.load %arg2[%c1] : memref<8xf32, #tpu.memory_space<smem>>
    %97 = vector.broadcast %96 : f32 to vector<16x32xf32>
    %98 = arith.mulf %97, %95 : vector<16x32xf32>
    %99 = arith.addf %55, %98 : vector<16x32xf32>
    %cst_26 = arith.constant dense<0.000000e+00> : vector<16x128xf32>
    %100 = tpu.matmul %75, %1, %cst_26 {dimension_numbers = #tpu.dot_dimension_numbers<[1], [0], [0], [1], [0, 0, 1, 1], [], []>} : vector<16x32xf32>, vector<32x128xf32>, vector<16x128xf32> -> vector<16x128xf32>
    %cst_27 = arith.constant dense<0.000000e+00> : vector<16x128xf32>
    %101 = tpu.matmul %95, %4, %cst_27 {dimension_numbers = #tpu.dot_dimension_numbers<[1], [0], [0], [1], [0, 0, 1, 1], [], []>} : vector<16x32xf32>, vector<32x128xf32>, vector<16x128xf32> -> vector<16x128xf32>
    %c32 = arith.constant 32 : index
    %c0_28 = arith.constant 0 : index
    %102 = vector.load %arg4[%c32, %c0_28] : memref<128x128xf32, #tpu.memory_space<vmem>>, vector<16x128xf32>
    %103 = arith.addf %102, %100 : vector<16x128xf32>
    %104 = vector.extract_strided_slice %103 {offsets = [0, 0], sizes = [16, 96], strides = [1, 1]} : vector<16x128xf32> to vector<16x96xf32>
    %105 = arith.negf %104 : vector<16x96xf32>
    %106 = math.exp %105 : vector<16x96xf32>
    %cst_29 = arith.constant 1.000000e+00 : f32
    %107 = vector.broadcast %cst_29 : f32 to vector<16x96xf32>
    %108 = arith.addf %107, %106 : vector<16x96xf32>
    %109 = arith.divf %107, %108 : vector<16x96xf32>
    %110 = vector.extract_strided_slice %103 {offsets = [0, 96], sizes = [16, 32], strides = [1, 1]} : vector<16x128xf32> to vector<16x32xf32>
    %111 = math.tanh %110 : vector<16x32xf32>
    %112 = vector.extract_strided_slice %109 {offsets = [0, 0], sizes = [16, 32], strides = [1, 1]} : vector<16x96xf32> to vector<16x32xf32>
    %113 = vector.extract_strided_slice %109 {offsets = [0, 32], sizes = [16, 32], strides = [1, 1]} : vector<16x96xf32> to vector<16x32xf32>
    %114 = vector.extract_strided_slice %109 {offsets = [0, 64], sizes = [16, 32], strides = [1, 1]} : vector<16x96xf32> to vector<16x32xf32>
    %115 = arith.mulf %113, %73 : vector<16x32xf32>
    %116 = arith.mulf %112, %111 : vector<16x32xf32>
    %117 = arith.addf %115, %116 : vector<16x32xf32>
    %118 = math.tanh %117 : vector<16x32xf32>
    %119 = arith.mulf %114, %118 : vector<16x32xf32>
    %cst_30 = arith.constant dense<0.000000e+00> : vector<16x128xf32>
    %120 = tpu.matmul %119, %3, %cst_30 {dimension_numbers = #tpu.dot_dimension_numbers<[1], [0], [0], [1], [0, 0, 1, 1], [], []>} : vector<16x32xf32>, vector<32x128xf32>, vector<16x128xf32> -> vector<16x128xf32>
    %121 = arith.addf %120, %101 : vector<16x128xf32>
    %122 = vector.broadcast %5 : vector<1x128xf32> to vector<16x128xf32>
    %123 = arith.addf %121, %122 : vector<16x128xf32>
    %124 = vector.extract_strided_slice %123 {offsets = [0, 0], sizes = [16, 96], strides = [1, 1]} : vector<16x128xf32> to vector<16x96xf32>
    %125 = arith.negf %124 : vector<16x96xf32>
    %126 = math.exp %125 : vector<16x96xf32>
    %cst_31 = arith.constant 1.000000e+00 : f32
    %127 = vector.broadcast %cst_31 : f32 to vector<16x96xf32>
    %128 = arith.addf %127, %126 : vector<16x96xf32>
    %129 = arith.divf %127, %128 : vector<16x96xf32>
    %130 = vector.extract_strided_slice %123 {offsets = [0, 96], sizes = [16, 32], strides = [1, 1]} : vector<16x128xf32> to vector<16x32xf32>
    %131 = math.tanh %130 : vector<16x32xf32>
    %132 = vector.extract_strided_slice %129 {offsets = [0, 0], sizes = [16, 32], strides = [1, 1]} : vector<16x96xf32> to vector<16x32xf32>
    %133 = vector.extract_strided_slice %129 {offsets = [0, 32], sizes = [16, 32], strides = [1, 1]} : vector<16x96xf32> to vector<16x32xf32>
    %134 = vector.extract_strided_slice %129 {offsets = [0, 64], sizes = [16, 32], strides = [1, 1]} : vector<16x96xf32> to vector<16x32xf32>
    %135 = arith.mulf %133, %93 : vector<16x32xf32>
    %136 = arith.mulf %132, %131 : vector<16x32xf32>
    %137 = arith.addf %135, %136 : vector<16x32xf32>
    %138 = math.tanh %137 : vector<16x32xf32>
    %139 = arith.mulf %134, %138 : vector<16x32xf32>
    %c2 = arith.constant 2 : index
    %140 = memref.load %arg2[%c2] : memref<8xf32, #tpu.memory_space<smem>>
    %141 = vector.broadcast %140 : f32 to vector<16x32xf32>
    %142 = arith.mulf %141, %139 : vector<16x32xf32>
    %143 = arith.addf %99, %142 : vector<16x32xf32>
    %cst_32 = arith.constant dense<0.000000e+00> : vector<16x128xf32>
    %144 = tpu.matmul %119, %1, %cst_32 {dimension_numbers = #tpu.dot_dimension_numbers<[1], [0], [0], [1], [0, 0, 1, 1], [], []>} : vector<16x32xf32>, vector<32x128xf32>, vector<16x128xf32> -> vector<16x128xf32>
    %cst_33 = arith.constant dense<0.000000e+00> : vector<16x128xf32>
    %145 = tpu.matmul %139, %4, %cst_33 {dimension_numbers = #tpu.dot_dimension_numbers<[1], [0], [0], [1], [0, 0, 1, 1], [], []>} : vector<16x32xf32>, vector<32x128xf32>, vector<16x128xf32> -> vector<16x128xf32>
    %c48_34 = arith.constant 48 : index
    %c0_35 = arith.constant 0 : index
    %146 = vector.load %arg4[%c48_34, %c0_35] : memref<128x128xf32, #tpu.memory_space<vmem>>, vector<16x128xf32>
    %147 = arith.addf %146, %144 : vector<16x128xf32>
    %148 = vector.extract_strided_slice %147 {offsets = [0, 0], sizes = [16, 96], strides = [1, 1]} : vector<16x128xf32> to vector<16x96xf32>
    %149 = arith.negf %148 : vector<16x96xf32>
    %150 = math.exp %149 : vector<16x96xf32>
    %cst_36 = arith.constant 1.000000e+00 : f32
    %151 = vector.broadcast %cst_36 : f32 to vector<16x96xf32>
    %152 = arith.addf %151, %150 : vector<16x96xf32>
    %153 = arith.divf %151, %152 : vector<16x96xf32>
    %154 = vector.extract_strided_slice %147 {offsets = [0, 96], sizes = [16, 32], strides = [1, 1]} : vector<16x128xf32> to vector<16x32xf32>
    %155 = math.tanh %154 : vector<16x32xf32>
    %156 = vector.extract_strided_slice %153 {offsets = [0, 0], sizes = [16, 32], strides = [1, 1]} : vector<16x96xf32> to vector<16x32xf32>
    %157 = vector.extract_strided_slice %153 {offsets = [0, 32], sizes = [16, 32], strides = [1, 1]} : vector<16x96xf32> to vector<16x32xf32>
    %158 = vector.extract_strided_slice %153 {offsets = [0, 64], sizes = [16, 32], strides = [1, 1]} : vector<16x96xf32> to vector<16x32xf32>
    %159 = arith.mulf %157, %117 : vector<16x32xf32>
    %160 = arith.mulf %156, %155 : vector<16x32xf32>
    %161 = arith.addf %159, %160 : vector<16x32xf32>
    %162 = math.tanh %161 : vector<16x32xf32>
    %163 = arith.mulf %158, %162 : vector<16x32xf32>
    %cst_37 = arith.constant dense<0.000000e+00> : vector<16x128xf32>
    %164 = tpu.matmul %163, %3, %cst_37 {dimension_numbers = #tpu.dot_dimension_numbers<[1], [0], [0], [1], [0, 0, 1, 1], [], []>} : vector<16x32xf32>, vector<32x128xf32>, vector<16x128xf32> -> vector<16x128xf32>
    %165 = arith.addf %164, %145 : vector<16x128xf32>
    %166 = vector.broadcast %5 : vector<1x128xf32> to vector<16x128xf32>
    %167 = arith.addf %165, %166 : vector<16x128xf32>
    %168 = vector.extract_strided_slice %167 {offsets = [0, 0], sizes = [16, 96], strides = [1, 1]} : vector<16x128xf32> to vector<16x96xf32>
    %169 = arith.negf %168 : vector<16x96xf32>
    %170 = math.exp %169 : vector<16x96xf32>
    %cst_38 = arith.constant 1.000000e+00 : f32
    %171 = vector.broadcast %cst_38 : f32 to vector<16x96xf32>
    %172 = arith.addf %171, %170 : vector<16x96xf32>
    %173 = arith.divf %171, %172 : vector<16x96xf32>
    %174 = vector.extract_strided_slice %167 {offsets = [0, 96], sizes = [16, 32], strides = [1, 1]} : vector<16x128xf32> to vector<16x32xf32>
    %175 = math.tanh %174 : vector<16x32xf32>
    %176 = vector.extract_strided_slice %173 {offsets = [0, 0], sizes = [16, 32], strides = [1, 1]} : vector<16x96xf32> to vector<16x32xf32>
    %177 = vector.extract_strided_slice %173 {offsets = [0, 32], sizes = [16, 32], strides = [1, 1]} : vector<16x96xf32> to vector<16x32xf32>
    %178 = vector.extract_strided_slice %173 {offsets = [0, 64], sizes = [16, 32], strides = [1, 1]} : vector<16x96xf32> to vector<16x32xf32>
    %179 = arith.mulf %177, %137 : vector<16x32xf32>
    %180 = arith.mulf %176, %175 : vector<16x32xf32>
    %181 = arith.addf %179, %180 : vector<16x32xf32>
    %182 = math.tanh %181 : vector<16x32xf32>
    %183 = arith.mulf %178, %182 : vector<16x32xf32>
    %c3 = arith.constant 3 : index
    %184 = memref.load %arg2[%c3] : memref<8xf32, #tpu.memory_space<smem>>
    %185 = vector.broadcast %184 : f32 to vector<16x32xf32>
    %186 = arith.mulf %185, %183 : vector<16x32xf32>
    %187 = arith.addf %143, %186 : vector<16x32xf32>
    %cst_39 = arith.constant dense<0.000000e+00> : vector<16x128xf32>
    %188 = tpu.matmul %163, %1, %cst_39 {dimension_numbers = #tpu.dot_dimension_numbers<[1], [0], [0], [1], [0, 0, 1, 1], [], []>} : vector<16x32xf32>, vector<32x128xf32>, vector<16x128xf32> -> vector<16x128xf32>
    %cst_40 = arith.constant dense<0.000000e+00> : vector<16x128xf32>
    %189 = tpu.matmul %183, %4, %cst_40 {dimension_numbers = #tpu.dot_dimension_numbers<[1], [0], [0], [1], [0, 0, 1, 1], [], []>} : vector<16x32xf32>, vector<32x128xf32>, vector<16x128xf32> -> vector<16x128xf32>
    %c64 = arith.constant 64 : index
    %c0_41 = arith.constant 0 : index
    %190 = vector.load %arg4[%c64, %c0_41] : memref<128x128xf32, #tpu.memory_space<vmem>>, vector<16x128xf32>
    %191 = arith.addf %190, %188 : vector<16x128xf32>
    %192 = vector.extract_strided_slice %191 {offsets = [0, 0], sizes = [16, 96], strides = [1, 1]} : vector<16x128xf32> to vector<16x96xf32>
    %193 = arith.negf %192 : vector<16x96xf32>
    %194 = math.exp %193 : vector<16x96xf32>
    %cst_42 = arith.constant 1.000000e+00 : f32
    %195 = vector.broadcast %cst_42 : f32 to vector<16x96xf32>
    %196 = arith.addf %195, %194 : vector<16x96xf32>
    %197 = arith.divf %195, %196 : vector<16x96xf32>
    %198 = vector.extract_strided_slice %191 {offsets = [0, 96], sizes = [16, 32], strides = [1, 1]} : vector<16x128xf32> to vector<16x32xf32>
    %199 = math.tanh %198 : vector<16x32xf32>
    %200 = vector.extract_strided_slice %197 {offsets = [0, 0], sizes = [16, 32], strides = [1, 1]} : vector<16x96xf32> to vector<16x32xf32>
    %201 = vector.extract_strided_slice %197 {offsets = [0, 32], sizes = [16, 32], strides = [1, 1]} : vector<16x96xf32> to vector<16x32xf32>
    %202 = vector.extract_strided_slice %197 {offsets = [0, 64], sizes = [16, 32], strides = [1, 1]} : vector<16x96xf32> to vector<16x32xf32>
    %203 = arith.mulf %201, %161 : vector<16x32xf32>
    %204 = arith.mulf %200, %199 : vector<16x32xf32>
    %205 = arith.addf %203, %204 : vector<16x32xf32>
    %206 = math.tanh %205 : vector<16x32xf32>
    %207 = arith.mulf %202, %206 : vector<16x32xf32>
    %cst_43 = arith.constant dense<0.000000e+00> : vector<16x128xf32>
    %208 = tpu.matmul %207, %3, %cst_43 {dimension_numbers = #tpu.dot_dimension_numbers<[1], [0], [0], [1], [0, 0, 1, 1], [], []>} : vector<16x32xf32>, vector<32x128xf32>, vector<16x128xf32> -> vector<16x128xf32>
    %209 = arith.addf %208, %189 : vector<16x128xf32>
    %210 = vector.broadcast %5 : vector<1x128xf32> to vector<16x128xf32>
    %211 = arith.addf %209, %210 : vector<16x128xf32>
    %212 = vector.extract_strided_slice %211 {offsets = [0, 0], sizes = [16, 96], strides = [1, 1]} : vector<16x128xf32> to vector<16x96xf32>
    %213 = arith.negf %212 : vector<16x96xf32>
    %214 = math.exp %213 : vector<16x96xf32>
    %cst_44 = arith.constant 1.000000e+00 : f32
    %215 = vector.broadcast %cst_44 : f32 to vector<16x96xf32>
    %216 = arith.addf %215, %214 : vector<16x96xf32>
    %217 = arith.divf %215, %216 : vector<16x96xf32>
    %218 = vector.extract_strided_slice %211 {offsets = [0, 96], sizes = [16, 32], strides = [1, 1]} : vector<16x128xf32> to vector<16x32xf32>
    %219 = math.tanh %218 : vector<16x32xf32>
    %220 = vector.extract_strided_slice %217 {offsets = [0, 0], sizes = [16, 32], strides = [1, 1]} : vector<16x96xf32> to vector<16x32xf32>
    %221 = vector.extract_strided_slice %217 {offsets = [0, 32], sizes = [16, 32], strides = [1, 1]} : vector<16x96xf32> to vector<16x32xf32>
    %222 = vector.extract_strided_slice %217 {offsets = [0, 64], sizes = [16, 32], strides = [1, 1]} : vector<16x96xf32> to vector<16x32xf32>
    %223 = arith.mulf %221, %181 : vector<16x32xf32>
    %224 = arith.mulf %220, %219 : vector<16x32xf32>
    %225 = arith.addf %223, %224 : vector<16x32xf32>
    %226 = math.tanh %225 : vector<16x32xf32>
    %227 = arith.mulf %222, %226 : vector<16x32xf32>
    %c4 = arith.constant 4 : index
    %228 = memref.load %arg2[%c4] : memref<8xf32, #tpu.memory_space<smem>>
    %229 = vector.broadcast %228 : f32 to vector<16x32xf32>
    %230 = arith.mulf %229, %227 : vector<16x32xf32>
    %231 = arith.addf %187, %230 : vector<16x32xf32>
    %cst_45 = arith.constant dense<0.000000e+00> : vector<16x128xf32>
    %232 = tpu.matmul %207, %1, %cst_45 {dimension_numbers = #tpu.dot_dimension_numbers<[1], [0], [0], [1], [0, 0, 1, 1], [], []>} : vector<16x32xf32>, vector<32x128xf32>, vector<16x128xf32> -> vector<16x128xf32>
    %cst_46 = arith.constant dense<0.000000e+00> : vector<16x128xf32>
    %233 = tpu.matmul %227, %4, %cst_46 {dimension_numbers = #tpu.dot_dimension_numbers<[1], [0], [0], [1], [0, 0, 1, 1], [], []>} : vector<16x32xf32>, vector<32x128xf32>, vector<16x128xf32> -> vector<16x128xf32>
    %c80 = arith.constant 80 : index
    %c0_47 = arith.constant 0 : index
    %234 = vector.load %arg4[%c80, %c0_47] : memref<128x128xf32, #tpu.memory_space<vmem>>, vector<16x128xf32>
    %235 = arith.addf %234, %232 : vector<16x128xf32>
    %236 = vector.extract_strided_slice %235 {offsets = [0, 0], sizes = [16, 96], strides = [1, 1]} : vector<16x128xf32> to vector<16x96xf32>
    %237 = arith.negf %236 : vector<16x96xf32>
    %238 = math.exp %237 : vector<16x96xf32>
    %cst_48 = arith.constant 1.000000e+00 : f32
    %239 = vector.broadcast %cst_48 : f32 to vector<16x96xf32>
    %240 = arith.addf %239, %238 : vector<16x96xf32>
    %241 = arith.divf %239, %240 : vector<16x96xf32>
    %242 = vector.extract_strided_slice %235 {offsets = [0, 96], sizes = [16, 32], strides = [1, 1]} : vector<16x128xf32> to vector<16x32xf32>
    %243 = math.tanh %242 : vector<16x32xf32>
    %244 = vector.extract_strided_slice %241 {offsets = [0, 0], sizes = [16, 32], strides = [1, 1]} : vector<16x96xf32> to vector<16x32xf32>
    %245 = vector.extract_strided_slice %241 {offsets = [0, 32], sizes = [16, 32], strides = [1, 1]} : vector<16x96xf32> to vector<16x32xf32>
    %246 = vector.extract_strided_slice %241 {offsets = [0, 64], sizes = [16, 32], strides = [1, 1]} : vector<16x96xf32> to vector<16x32xf32>
    %247 = arith.mulf %245, %205 : vector<16x32xf32>
    %248 = arith.mulf %244, %243 : vector<16x32xf32>
    %249 = arith.addf %247, %248 : vector<16x32xf32>
    %250 = math.tanh %249 : vector<16x32xf32>
    %251 = arith.mulf %246, %250 : vector<16x32xf32>
    %cst_49 = arith.constant dense<0.000000e+00> : vector<16x128xf32>
    %252 = tpu.matmul %251, %3, %cst_49 {dimension_numbers = #tpu.dot_dimension_numbers<[1], [0], [0], [1], [0, 0, 1, 1], [], []>} : vector<16x32xf32>, vector<32x128xf32>, vector<16x128xf32> -> vector<16x128xf32>
    %253 = arith.addf %252, %233 : vector<16x128xf32>
    %254 = vector.broadcast %5 : vector<1x128xf32> to vector<16x128xf32>
    %255 = arith.addf %253, %254 : vector<16x128xf32>
    %256 = vector.extract_strided_slice %255 {offsets = [0, 0], sizes = [16, 96], strides = [1, 1]} : vector<16x128xf32> to vector<16x96xf32>
    %257 = arith.negf %256 : vector<16x96xf32>
    %258 = math.exp %257 : vector<16x96xf32>
    %cst_50 = arith.constant 1.000000e+00 : f32
    %259 = vector.broadcast %cst_50 : f32 to vector<16x96xf32>
    %260 = arith.addf %259, %258 : vector<16x96xf32>
    %261 = arith.divf %259, %260 : vector<16x96xf32>
    %262 = vector.extract_strided_slice %255 {offsets = [0, 96], sizes = [16, 32], strides = [1, 1]} : vector<16x128xf32> to vector<16x32xf32>
    %263 = math.tanh %262 : vector<16x32xf32>
    %264 = vector.extract_strided_slice %261 {offsets = [0, 0], sizes = [16, 32], strides = [1, 1]} : vector<16x96xf32> to vector<16x32xf32>
    %265 = vector.extract_strided_slice %261 {offsets = [0, 32], sizes = [16, 32], strides = [1, 1]} : vector<16x96xf32> to vector<16x32xf32>
    %266 = vector.extract_strided_slice %261 {offsets = [0, 64], sizes = [16, 32], strides = [1, 1]} : vector<16x96xf32> to vector<16x32xf32>
    %267 = arith.mulf %265, %225 : vector<16x32xf32>
    %268 = arith.mulf %264, %263 : vector<16x32xf32>
    %269 = arith.addf %267, %268 : vector<16x32xf32>
    %270 = math.tanh %269 : vector<16x32xf32>
    %271 = arith.mulf %266, %270 : vector<16x32xf32>
    %c5 = arith.constant 5 : index
    %272 = memref.load %arg2[%c5] : memref<8xf32, #tpu.memory_space<smem>>
    %273 = vector.broadcast %272 : f32 to vector<16x32xf32>
    %274 = arith.mulf %273, %271 : vector<16x32xf32>
    %275 = arith.addf %231, %274 : vector<16x32xf32>
    %cst_51 = arith.constant dense<0.000000e+00> : vector<16x128xf32>
    %276 = tpu.matmul %251, %1, %cst_51 {dimension_numbers = #tpu.dot_dimension_numbers<[1], [0], [0], [1], [0, 0, 1, 1], [], []>} : vector<16x32xf32>, vector<32x128xf32>, vector<16x128xf32> -> vector<16x128xf32>
    %cst_52 = arith.constant dense<0.000000e+00> : vector<16x128xf32>
    %277 = tpu.matmul %271, %4, %cst_52 {dimension_numbers = #tpu.dot_dimension_numbers<[1], [0], [0], [1], [0, 0, 1, 1], [], []>} : vector<16x32xf32>, vector<32x128xf32>, vector<16x128xf32> -> vector<16x128xf32>
    %c96 = arith.constant 96 : index
    %c0_53 = arith.constant 0 : index
    %278 = vector.load %arg4[%c96, %c0_53] : memref<128x128xf32, #tpu.memory_space<vmem>>, vector<16x128xf32>
    %279 = arith.addf %278, %276 : vector<16x128xf32>
    %280 = vector.extract_strided_slice %279 {offsets = [0, 0], sizes = [16, 96], strides = [1, 1]} : vector<16x128xf32> to vector<16x96xf32>
    %281 = arith.negf %280 : vector<16x96xf32>
    %282 = math.exp %281 : vector<16x96xf32>
    %cst_54 = arith.constant 1.000000e+00 : f32
    %283 = vector.broadcast %cst_54 : f32 to vector<16x96xf32>
    %284 = arith.addf %283, %282 : vector<16x96xf32>
    %285 = arith.divf %283, %284 : vector<16x96xf32>
    %286 = vector.extract_strided_slice %279 {offsets = [0, 96], sizes = [16, 32], strides = [1, 1]} : vector<16x128xf32> to vector<16x32xf32>
    %287 = math.tanh %286 : vector<16x32xf32>
    %288 = vector.extract_strided_slice %285 {offsets = [0, 0], sizes = [16, 32], strides = [1, 1]} : vector<16x96xf32> to vector<16x32xf32>
    %289 = vector.extract_strided_slice %285 {offsets = [0, 32], sizes = [16, 32], strides = [1, 1]} : vector<16x96xf32> to vector<16x32xf32>
    %290 = vector.extract_strided_slice %285 {offsets = [0, 64], sizes = [16, 32], strides = [1, 1]} : vector<16x96xf32> to vector<16x32xf32>
    %291 = arith.mulf %289, %249 : vector<16x32xf32>
    %292 = arith.mulf %288, %287 : vector<16x32xf32>
    %293 = arith.addf %291, %292 : vector<16x32xf32>
    %294 = math.tanh %293 : vector<16x32xf32>
    %295 = arith.mulf %290, %294 : vector<16x32xf32>
    %cst_55 = arith.constant dense<0.000000e+00> : vector<16x128xf32>
    %296 = tpu.matmul %295, %3, %cst_55 {dimension_numbers = #tpu.dot_dimension_numbers<[1], [0], [0], [1], [0, 0, 1, 1], [], []>} : vector<16x32xf32>, vector<32x128xf32>, vector<16x128xf32> -> vector<16x128xf32>
    %297 = arith.addf %296, %277 : vector<16x128xf32>
    %298 = vector.broadcast %5 : vector<1x128xf32> to vector<16x128xf32>
    %299 = arith.addf %297, %298 : vector<16x128xf32>
    %300 = vector.extract_strided_slice %299 {offsets = [0, 0], sizes = [16, 96], strides = [1, 1]} : vector<16x128xf32> to vector<16x96xf32>
    %301 = arith.negf %300 : vector<16x96xf32>
    %302 = math.exp %301 : vector<16x96xf32>
    %cst_56 = arith.constant 1.000000e+00 : f32
    %303 = vector.broadcast %cst_56 : f32 to vector<16x96xf32>
    %304 = arith.addf %303, %302 : vector<16x96xf32>
    %305 = arith.divf %303, %304 : vector<16x96xf32>
    %306 = vector.extract_strided_slice %299 {offsets = [0, 96], sizes = [16, 32], strides = [1, 1]} : vector<16x128xf32> to vector<16x32xf32>
    %307 = math.tanh %306 : vector<16x32xf32>
    %308 = vector.extract_strided_slice %305 {offsets = [0, 0], sizes = [16, 32], strides = [1, 1]} : vector<16x96xf32> to vector<16x32xf32>
    %309 = vector.extract_strided_slice %305 {offsets = [0, 32], sizes = [16, 32], strides = [1, 1]} : vector<16x96xf32> to vector<16x32xf32>
    %310 = vector.extract_strided_slice %305 {offsets = [0, 64], sizes = [16, 32], strides = [1, 1]} : vector<16x96xf32> to vector<16x32xf32>
    %311 = arith.mulf %309, %269 : vector<16x32xf32>
    %312 = arith.mulf %308, %307 : vector<16x32xf32>
    %313 = arith.addf %311, %312 : vector<16x32xf32>
    %314 = math.tanh %313 : vector<16x32xf32>
    %315 = arith.mulf %310, %314 : vector<16x32xf32>
    %c6 = arith.constant 6 : index
    %316 = memref.load %arg2[%c6] : memref<8xf32, #tpu.memory_space<smem>>
    %317 = vector.broadcast %316 : f32 to vector<16x32xf32>
    %318 = arith.mulf %317, %315 : vector<16x32xf32>
    %319 = arith.addf %275, %318 : vector<16x32xf32>
    %cst_57 = arith.constant dense<0.000000e+00> : vector<16x128xf32>
    %320 = tpu.matmul %295, %1, %cst_57 {dimension_numbers = #tpu.dot_dimension_numbers<[1], [0], [0], [1], [0, 0, 1, 1], [], []>} : vector<16x32xf32>, vector<32x128xf32>, vector<16x128xf32> -> vector<16x128xf32>
    %cst_58 = arith.constant dense<0.000000e+00> : vector<16x128xf32>
    %321 = tpu.matmul %315, %4, %cst_58 {dimension_numbers = #tpu.dot_dimension_numbers<[1], [0], [0], [1], [0, 0, 1, 1], [], []>} : vector<16x32xf32>, vector<32x128xf32>, vector<16x128xf32> -> vector<16x128xf32>
    %c112 = arith.constant 112 : index
    %c0_59 = arith.constant 0 : index
    %322 = vector.load %arg4[%c112, %c0_59] : memref<128x128xf32, #tpu.memory_space<vmem>>, vector<16x128xf32>
    %323 = arith.addf %322, %320 : vector<16x128xf32>
    %324 = vector.extract_strided_slice %323 {offsets = [0, 0], sizes = [16, 96], strides = [1, 1]} : vector<16x128xf32> to vector<16x96xf32>
    %325 = arith.negf %324 : vector<16x96xf32>
    %326 = math.exp %325 : vector<16x96xf32>
    %cst_60 = arith.constant 1.000000e+00 : f32
    %327 = vector.broadcast %cst_60 : f32 to vector<16x96xf32>
    %328 = arith.addf %327, %326 : vector<16x96xf32>
    %329 = arith.divf %327, %328 : vector<16x96xf32>
    %330 = vector.extract_strided_slice %323 {offsets = [0, 96], sizes = [16, 32], strides = [1, 1]} : vector<16x128xf32> to vector<16x32xf32>
    %331 = math.tanh %330 : vector<16x32xf32>
    %332 = vector.extract_strided_slice %329 {offsets = [0, 0], sizes = [16, 32], strides = [1, 1]} : vector<16x96xf32> to vector<16x32xf32>
    %333 = vector.extract_strided_slice %329 {offsets = [0, 32], sizes = [16, 32], strides = [1, 1]} : vector<16x96xf32> to vector<16x32xf32>
    %334 = vector.extract_strided_slice %329 {offsets = [0, 64], sizes = [16, 32], strides = [1, 1]} : vector<16x96xf32> to vector<16x32xf32>
    %335 = arith.mulf %333, %293 : vector<16x32xf32>
    %336 = arith.mulf %332, %331 : vector<16x32xf32>
    %337 = arith.addf %335, %336 : vector<16x32xf32>
    %338 = math.tanh %337 : vector<16x32xf32>
    %339 = arith.mulf %334, %338 : vector<16x32xf32>
    %cst_61 = arith.constant dense<0.000000e+00> : vector<16x128xf32>
    %340 = tpu.matmul %339, %3, %cst_61 {dimension_numbers = #tpu.dot_dimension_numbers<[1], [0], [0], [1], [0, 0, 1, 1], [], []>} : vector<16x32xf32>, vector<32x128xf32>, vector<16x128xf32> -> vector<16x128xf32>
    %341 = arith.addf %340, %321 : vector<16x128xf32>
    %342 = vector.broadcast %5 : vector<1x128xf32> to vector<16x128xf32>
    %343 = arith.addf %341, %342 : vector<16x128xf32>
    %344 = vector.extract_strided_slice %343 {offsets = [0, 0], sizes = [16, 96], strides = [1, 1]} : vector<16x128xf32> to vector<16x96xf32>
    %345 = arith.negf %344 : vector<16x96xf32>
    %346 = math.exp %345 : vector<16x96xf32>
    %cst_62 = arith.constant 1.000000e+00 : f32
    %347 = vector.broadcast %cst_62 : f32 to vector<16x96xf32>
    %348 = arith.addf %347, %346 : vector<16x96xf32>
    %349 = arith.divf %347, %348 : vector<16x96xf32>
    %350 = vector.extract_strided_slice %343 {offsets = [0, 96], sizes = [16, 32], strides = [1, 1]} : vector<16x128xf32> to vector<16x32xf32>
    %351 = math.tanh %350 : vector<16x32xf32>
    %352 = vector.extract_strided_slice %349 {offsets = [0, 0], sizes = [16, 32], strides = [1, 1]} : vector<16x96xf32> to vector<16x32xf32>
    %353 = vector.extract_strided_slice %349 {offsets = [0, 32], sizes = [16, 32], strides = [1, 1]} : vector<16x96xf32> to vector<16x32xf32>
    %354 = vector.extract_strided_slice %349 {offsets = [0, 64], sizes = [16, 32], strides = [1, 1]} : vector<16x96xf32> to vector<16x32xf32>
    %355 = arith.mulf %353, %313 : vector<16x32xf32>
    %356 = arith.mulf %352, %351 : vector<16x32xf32>
    %357 = arith.addf %355, %356 : vector<16x32xf32>
    %358 = math.tanh %357 : vector<16x32xf32>
    %359 = arith.mulf %354, %358 : vector<16x32xf32>
    %c7 = arith.constant 7 : index
    %360 = memref.load %arg2[%c7] : memref<8xf32, #tpu.memory_space<smem>>
    %361 = vector.broadcast %360 : f32 to vector<16x32xf32>
    %362 = arith.mulf %361, %359 : vector<16x32xf32>
    %363 = arith.addf %319, %362 : vector<16x32xf32>
    %c128 = arith.constant 128 : index
    %c0_63 = arith.constant 0 : index
    %364 = vector.load %arg1[%c128, %c0_63] : memref<168x128xf32, #tpu.memory_space<vmem>>, vector<32x16xf32>
    %cst_64 = arith.constant dense<0.000000e+00> : vector<16x16xf32>
    %365 = tpu.matmul %363, %364, %cst_64 {dimension_numbers = #tpu.dot_dimension_numbers<[1], [0], [0], [1], [0, 0, 1, 1], [], []>} : vector<16x32xf32>, vector<32x16xf32>, vector<16x16xf32> -> vector<16x16xf32>
    %c160 = arith.constant 160 : index
    %c0_65 = arith.constant 0 : index
    %366 = vector.load %arg1[%c160, %c0_65] : memref<168x128xf32, #tpu.memory_space<vmem>>, vector<1x16xf32>
    %367 = vector.broadcast %366 : vector<1x16xf32> to vector<16x16xf32>
    %368 = arith.addf %365, %367 : vector<16x16xf32>
    %cst_66 = arith.constant dense<0xFF800000> : vector<16xf32>
    %369 = vector.multi_reduction <maximumf>, %368, %cst_66 [1] : vector<16x16xf32> to vector<16xf32>
    %370 = vector.shape_cast %369 : vector<16xf32> to vector<16x1xf32>
    %371 = vector.broadcast %370 : vector<16x1xf32> to vector<16x16xf32>
    %372 = arith.subf %368, %371 : vector<16x16xf32>
    %373 = math.exp %372 : vector<16x16xf32>
    %cst_67 = arith.constant dense<0.000000e+00> : vector<16xf32>
    %374 = vector.multi_reduction <add>, %373, %cst_67 [1] : vector<16x16xf32> to vector<16xf32>
    %375 = vector.shape_cast %374 : vector<16xf32> to vector<16x1xf32>
    %376 = math.log %375 : vector<16x1xf32>
    %377 = vector.broadcast %376 : vector<16x1xf32> to vector<16x16xf32>
    %378 = arith.subf %372, %377 : vector<16x16xf32>
    %379 = vector.extract_strided_slice %378 {offsets = [0, 0], sizes = [10, 16], strides = [1, 1]} : vector<16x16xf32> to vector<10x16xf32>
    %c0_68 = arith.constant 0 : index
    %c0_69 = arith.constant 0 : index
    %380 = vector.load %arg3[%c0_68, %c0_69] : memref<10x16xf32, #tpu.memory_space<vmem>>, vector<10x16xf32>
    tpu.vector_store %arg3[%c0_68, %c0_69], %379 {strides = array<i32>} : memref<10x16xf32, #tpu.memory_space<vmem>>, vector<10x16xf32>,
    return
  }
}

</mosaic_0001>

<bundles_post_ra>
// kernel: forward.1
= control target key start
LH: loop header
LB: loop body
LE: loop exit
PB: predicated region body
PF: predicated region fallthrough
CT: control target
= control target key end

     0   :  { %8 = vsyncpa [#allocation5], 0  ;;  %s5034_s0 = inlined_call_operand.vmem [shape: f32[128,16], index: 0, kind: input, shape index: {}]   ;;  %s5035_s1 = inlined_call_operand.vmem [shape: f32[168,128], index: 1, kind: input, shape index: {}]   ;;  %s5036_s2 = inlined_call_operand.vmem [shape: f32[8], index: 2, kind: input, shape index: {}]   ;;  %s5037_s3 = inlined_call_operand.hbm [shape: f32[10,16], index: 3, kind: output, shape index: {}]  }
   0x1   :  { %9 = vsyncpa [#allocation4], 0  ;;  %s20_s14 = sshll.u32 %s5036_s2, 4  ;;  %s21_s14 = int_to_ptr.vmem [resolvable:$true] %s20_s14 }
   0x2   :  { %s4334_s15 = scalar_lea.vmem %s21_s14, 16  ;;  %p4339_p1 = scmp.lt.s32.totalorder %s21_s14, %s21_s14 }
   0x3   :  { %p4335_p0 = scmp.ne.s32.totalorder %s21_s14, %s4334_s15  ;;  %p4340_p2 = scmp.lt.s32.totalorder %s4334_s15, %s4334_s15 }
   0x5   :  { %p4341_p3 = por %p4340_p2, %p4339_p1 }
   0x7   :  { %p4342_p4 = pnand %p4341_p3, %p4335_p0 }
   0x9   :  { %4345 = shalt.err (!%p4342_p4)
}
   0xa   :  { %s4372_s16 = smov [#allocation3]  }
   0xb   :  { %23 = dma.vmem_to_smem %s21_s14, 16, %s4372_s16, [#allocation5]  }
   0xc   :  { %4368 = dma.done.wait [#allocation5], 16  }
   0xd   :  { %4369 = vsyncadd [#allocation5], 4294967280 }
   0xe   :  { %27 = sfence }
   0xf   :  { %v28_v0 = vld [vmem:[%s5035_s1] sm:$0xff]  ;;  %v29_v1 = vld [vmem:[%s5035_s1 + $0x8] sm:$0xff]  ;;  %vm64_vm0 = vcmask 130048   ;;  %v30_v4 = vld [vmem:[%s5035_s1 + $0x10] sm:$0xff]  ;;  %v4373_v6 = vmov 0.0   ;;  %s4375_s22 = smov 64  }
  0x10   :  { %v44_v2 = vld [vmem:[%s5034_s0] sm:$0xff]  ;;  %v3809_v3 = vpack.c.bf16 %v29_v1, %v28_v0  ;;  %v31_v5 = vld [vmem:[%s5035_s1 + $0x18] sm:$0xff]  ;;  %3553 = vmatprep.mubr.f32.mxu1 %v4373_v6  ;;  %v45_v8 = vld [vmem:[%s5034_s0 + $0x8] sm:$0xff]  ;;  %vm274_vm1 = vcmask 261120   ;;  %s619_s25 = sld [smem:[#allocation3]]  ;;  %s3268_s26 = sld [smem:[#allocation3 + $0x1]] }
  0x11   :  { %3510 = vmatprep.mubr.msk.f32.mxu0 %vm64_vm0, %v44_v2  ;;  %v4419_v7 = vpack.c.bf16 %v31_v5, %v30_v4  ;;  %v32_v9 = vld [vmem:[%s5035_s1 + $0x20] sm:$0xff]  ;;  %v46_v10 = vld [vmem:[%s5034_s0 + $0x10] sm:$0xff]  ;;  %v33_v11 = vld [vmem:[%s5035_s1 + $0x28] sm:$0xff]  ;;  %s3279_s27 = sld [smem:[#allocation3 + $0x2]]  ;;  %s3290_s28 = sld [smem:[#allocation3 + $0x3]]  ;;  %vm3215_vm2 = vcmask 123904  }
  0x12   :  { %3810 = vmatprep.subr.bf16.mxu0 %v3809_v3  ;;  %v4434_v12 = vpack.c.bf16 %v33_v11, %v32_v9  ;;  %v47_v13 = vld [vmem:[%s5034_s0 + $0x18] sm:$0xff]  ;;  %v48_v14 = vld [vmem:[%s5034_s0 + $0x20] sm:$0xff]  ;;  %v49_v15 = vld [vmem:[%s5034_s0 + $0x28] sm:$0xff]  ;;  %s3301_s4 = sld [smem:[#allocation3 + $0x4]]  ;;  %s3312_s7 = sld [smem:[#allocation3 + $0x5]] }
  0x13   :  { %3812 = vmatpush3.bf16.msra.mxu0 %v3809_v3  ;;  %v50_v16 = vld [vmem:[%s5034_s0 + $0x30] sm:$0xff]  ;;  %v51_v17 = vld [vmem:[%s5034_s0 + $0x38] sm:$0xff]  ;;  %v52_v18 = vld [vmem:[%s5034_s0 + $0x40] sm:$0xff]  ;;  %s3323_s8 = sld [smem:[#allocation3 + $0x6]]  ;;  %s3334_s17 = sld [smem:[#allocation3 + $0x7]] }
  0x14   :  { %3814 = vmatprep.subr.bf16.mxu0 %v4419_v7  ;;  %v53_v19 = vld [vmem:[%s5034_s0 + $0x48] sm:$0xff]  ;;  %v54_v20 = vld [vmem:[%s5034_s0 + $0x50] sm:$0xff]  ;;  %v55_v21 = vld [vmem:[%s5034_s0 + $0x58] sm:$0xff] }
  0x15   :  { %v56_v22 = vld [vmem:[%s5034_s0 + $0x60] sm:$0xff]  ;;  %v57_v23 = vld [vmem:[%s5034_s0 + $0x68] sm:$0xff]  ;;  %v58_v24 = vld [vmem:[%s5034_s0 + $0x70] sm:$0xff] }
  0x16   :  { %3511 = vmatmul.mubr.msk.f32.vlgmr.msra.gmra.mrb[0].mxu0 %vm64_vm0, %v45_v8  ;;  %v59_v25 = vld [vmem:[%s5034_s0 + $0x78] sm:$0xff]  ;;  %v4503_v26 = vld [vmem:[%s5035_s1 + $0x30] ss:$0 sm:$0xff]  ;;  %s4374_s0 = smov 32   ;;  %v40_v52 = vld [vmem:[%s5035_s1 + $0x60] sm:$0xff] }
  0x17   :  { %3816 = vmatpush3.bf16.msra.mxu0 %v4419_v7  ;;  %3513 = vmatprep.mubr.msk.f32.mxu0 %vm64_vm0, %v46_v10  ;;  %v39_v51 = vld [vmem:[%s5035_s1 + $0x58] sm:$0xff]  ;;  %v41_v53 = vld [vmem:[%s5035_s1 + $0x68] sm:$0xff]  ;;  %v42_v55 = vld [vmem:[%s5035_s1 + $0x70] sm:$0xff] }
  0x18   :  { %3818 = vmatprep.subr.bf16.mxu0 %v4434_v12  ;;  %v4526_v54 = vpack.c.bf16 %v40_v52, %v39_v51  ;;  %v4531_v56 = vpack.c.bf16 %v42_v55, %v41_v53  ;;  %v35_v57 = vld [vmem:[%s5035_s1 + $0x38] sm:$0xff]  ;;  %v36_v58 = vld [vmem:[%s5035_s1 + $0x40] sm:$0xff]  ;;  %v37_v62 = vld [vmem:[%s5035_s1 + $0x48] sm:$0xff] }
  0x19   :  { %v4542_v59 = vpack.c.bf16 %v36_v58, %v35_v57  ;;  %v38_v63 = vld [vmem:[%s5035_s1 + $0x50] sm:$0xff]  ;;  %v4578_v8 = vld [vmem:[%s5035_s1 + $0x78] ss:$0 sm:$0xff] }
  0x1a   :  { %3514 = vmatmul.mubr.msk.f32.gmra.mrb[2].mxu0 %vm64_vm0, %v47_v13  ;;  %3822 = vmatprep.subr.bf16.mxu1 %v4526_v54  ;;  %v4556_v0 = vpack.c.bf16 %v38_v63, %v37_v62 }
  0x1b   :  { %3516 = vmatprep.mubr.msk.f32.mxu0 %vm64_vm0, %v48_v14  ;;  %3820 = vmatpush3.bf16.msra.mxu0 %v4434_v12 }
  0x1c   :  { %3838 = vmatprep.subr.bf16.mxu0 %v4419_v7  ;;  %3824 = vmatpush3.bf16.msra.mxu1 %v4526_v54 }
  0x1d   :  { %3826 = vmatprep.subr.bf16.mxu1 %v4531_v56 }
  0x1e   :  { %3517 = vmatmul.mubr.msk.f32.gmra.mrb[4].mxu0 %vm64_vm0, %v49_v15 }
  0x1f   :  { %3519 = vmatprep.mubr.msk.f32.mxu0 %vm64_vm0, %v50_v16 }
  0x20   :  { %3828 = vmatpush3.bf16.msra.mxu1 %v4531_v56 }
  0x21   :  { %3830 = vmatprep.subr.bf16.mxu1 %v4542_v59 }
  0x22   :  { %3520 = vmatmul.mubr.msk.f32.gmra.mrb[6].mxu0 %vm64_vm0, %v51_v17 }
  0x23   :  { %3522 = vmatprep.mubr.msk.f32.mxu0 %vm64_vm0, %v52_v18  ;;  %3554 = vmatmul.mubr.f32.vlgmr.msra.gmra.mrb[0].mxu1 %v4373_v6 }
  0x24   :  { %3832 = vmatpush3.bf16.msra.mxu1 %v4542_v59 }
  0x25   :  { %3834 = vmatprep.subr.bf16.mxu1 %v4556_v0 }
  0x26   :  { %3523 = vmatmul.mubr.msk.f32.gmra.mrb[8].mxu0 %vm64_vm0, %v53_v19 }
  0x27   :  { %3525 = vmatprep.mubr.msk.f32.mxu0 %vm64_vm0, %v54_v20 }
  0x28   :  { %3836 = vmatpush3.bf16.msra.mxu1 %v4556_v0 }
  0x29   :  { %3846 = vmatprep.subr.bf16.mxu1 %v4526_v54 }
  0x2a   :  { %3526 = vmatmul.mubr.msk.f32.gmra.mrb[10].mxu0 %vm64_vm0, %v55_v21 }
  0x2b   :  { %3528 = vmatprep.mubr.msk.f32.mxu0 %vm64_vm0, %v56_v22 }
  0x2e   :  { %3529 = vmatmul.mubr.msk.f32.gmra.mrb[12].mxu0 %vm64_vm0, %v57_v23 }
  0x2f   :  { %3531 = vmatprep.mubr.msk.f32.mxu0 %vm64_vm0, %v58_v24 }
  0x32   :  { %3532 = vmatmul.mubr.msk.f32.gmra.mrb[14].mxu0 %vm64_vm0, %v59_v25 }
  0x33   :  { %3542 = vmatprep.mubr.f32.mxu0 %v4373_v6 }
  0x36   :  { %3543 = vmatmul.mubr.f32.vlgmr.msra.gmra.mrb[0].mxu0 %v4373_v6 }
  0x37   :  { %3840 = vmatpush3.bf16.msra.mxu0 %v4419_v7 }
  0x38   :  { %3842 = vmatprep.subr.bf16.mxu0 %v4434_v12 }
  0x3b   :  { %3844 = vmatpush3.bf16.msra.mxu0 %v4434_v12 }
  0x3c   :  { %3862 = vmatprep.subr.bf16.mxu0 %v4419_v7 }
 0x109   :  { %v3544_v27 = vpop.f32.mrb[0].mxu0 }
 0x10a   :  { %v344_v28 = vpop.f32.mrb[1].mxu0  ;;  %v4013_v30 = vadd.f32 %v3544_v27, %v4503_v26 }
 0x10b   :  { %v4014_v29 = vadd.f32 %v4503_v26, %v344_v28 }
 0x10c   :  { %v3252_v34 = vmul.f32 -1.442695, %v4013_v30 }
 0x10d   :  { %4068 = vtanh.f32 %v4014_v29  ;;  %v3251_v33 = vmul.f32 -1.442695, %v4014_v29 }
 0x10e   :  { %4070 = vtanh.f32 %v4013_v30 }
 0x10f   :  { %4072 = vpow2.f32 %v3251_v33 }
 0x110   :  { %4074 = vpow2.f32 %v3252_v34 }
 0x117   :  { %v4069_v31 = vpop.eup %4068 }
 0x118   :  { %450 = vrot.lane.b32.xlu0 %v4069_v31, %s4374_s0  ;;  %v4071_v32 = vpop.eup %4070 }
 0x119   :  { %v4073_v35 = vpop.eup %4072 }
 0x11a   :  { %v438_v36 = vadd.f32 1.0, %v4073_v35  ;;  %v4075_v37 = vpop.eup %4074 }
 0x11b   :  { %v439_v38 = vadd.f32 1.0, %v4075_v37 }
 0x11c   :  { %452 = vrot.lane.b32.xlu0 %v4071_v32, %s4374_s0  ;;  %4076 = vrcp.f32 %v438_v36 }
 0x11d   :  { %4078 = vrcp.f32 %v439_v38 }
 0x126   :  { %v4077_v39 = vpop.eup %4076 }
 0x127   :  { %v4079_v42 = vpop.eup %4078  ;;  %v446_v45 = vmul.f32 0.0, %v4077_v39 }
 0x128   :  { %v447_v48 = vmul.f32 0.0, %v4079_v42 }
 0x18a   :  { %v451_v40 = vpop.permute.xlu0 %450 }
 0x18b   :  { %v456_v41 = vmul.f32 %v4077_v39, %v451_v40 }
 0x18d   :  { %460 = vrot.lane.b32.xlu1 %v456_v41, %s4374_s0 }
 0x18e   :  { %v453_v43 = vpop.permute.xlu0 %452 }
 0x18f   :  { %v457_v44 = vmul.f32 %v4079_v42, %v453_v43 }
 0x191   :  { %462 = vrot.lane.b32.xlu1 %v457_v44, %s4374_s0 }
 0x1ff   :  { %v461_v46 = vpop.permute.xlu1 %460 }
 0x200   :  { %v4511_v47 = vadd.f32 %v461_v46, %v446_v45 }
 0x202   :  { %4080 = vtanh.f32 %v4511_v47 }
 0x203   :  { %v463_v49 = vpop.permute.xlu1 %462 }
 0x204   :  { %v4514_v50 = vadd.f32 %v463_v49, %v447_v48 }
 0x206   :  { %4082 = vtanh.f32 %v4514_v50 }
 0x20c   :  { %v4081_v60 = vpop.eup %4080 }
 0x20d   :  { %472 = vrot.lane.b32.xlu0 %v4081_v60, %s4374_s0 }
 0x210   :  { %v4083_v61 = vpop.eup %4082 }
 0x211   :  { %474 = vrot.lane.b32.xlu1 %v4083_v61, %s4374_s0 }
 0x27f   :  { %v473_v1 = vpop.permute.xlu0 %472 }
 0x280   :  { %v478_v2 = vmul.f32 %v4077_v39, %v473_v1 }
 0x282   :  { %482 = vrot.lane.b32.xlu0 %v478_v2, %s4375_s22 }
 0x283   :  { %v475_v3 = vpop.permute.xlu1 %474 }
 0x284   :  { %v479_v4 = vmul.f32 %v4079_v42, %v475_v3 }
 0x286   :  { %484 = vrot.lane.b32.xlu1 %v479_v4, %s4375_s22 }
 0x2f4   :  { %v483_v5 = vpop.permute.xlu0 %482 }
 0x2f5   :  { %3564 = vmatprep.mubr.msk.f32.mxu1 %vm274_vm1, %v483_v5  ;;  %3575 = vmatprep.mubr.msk.f32.mxu0 %vm274_vm1, %v483_v5 }
 0x2f8   :  { %v485_v6 = vpop.permute.xlu1 %484 }
 0x2f9   :  { %3565 = vmatmul.mubr.msk.f32.vlgmr.msra.gmra.mrb[0].mxu1 %vm274_vm1, %v485_v6  ;;  %3576 = vmatmul.mubr.msk.f32.vlgmr.msra.gmra.mrb[2].mxu0 %vm274_vm1, %v485_v6 }
 0x2fa   :  { %3848 = vmatpush3.bf16.msra.mxu1 %v4526_v54  ;;  %3864 = vmatpush3.bf16.msra.mxu0 %v4419_v7 }
 0x2fb   :  { %3850 = vmatprep.subr.bf16.mxu1 %v4531_v56  ;;  %3866 = vmatprep.subr.bf16.mxu0 %v4434_v12 }
 0x2fe   :  { %3852 = vmatpush3.bf16.msra.mxu1 %v4531_v56  ;;  %3868 = vmatpush3.bf16.msra.mxu0 %v4434_v12 }
 0x2ff   :  { %3854 = vmatprep.subr.bf16.mxu1 %v4542_v59  ;;  %3886 = vmatprep.subr.bf16.mxu0 %v4419_v7 }
 0x3cc   :  { %v3566_v9 = vpop.f32.mrb[0].mxu1  ;;  %v3577_v10 = vpop.f32.mrb[2].mxu0 }
 0x3cd   :  { %v570_v11 = vadd.f32 %v3566_v9, %v4578_v8  ;;  %v556_v13 = vpop.f32.mrb[1].mxu1  ;;  %v691_v14 = vpop.f32.mrb[3].mxu0  ;;  %v4015_v15 = vadd.f32 %v3577_v10, %v4503_v26 }
 0x3ce   :  { %v569_v16 = vadd.f32 %v4578_v8, %v556_v13  ;;  %v4016_v17 = vadd.f32 %v4503_v26, %v691_v14 }
 0x3cf   :  { %4084 = vtanh.f32 %v570_v11  ;;  %v3257_v22 = vmul.f32 -1.442695, %v570_v11  ;;  %v3263_v23 = vmul.f32 -1.442695, %v4015_v15 }
 0x3d0   :  { %4086 = vtanh.f32 %v4015_v15  ;;  %v3256_v24 = vmul.f32 -1.442695, %v569_v16  ;;  %v3262_v25 = vmul.f32 -1.442695, %v4016_v17 }
 0x3d1   :  { %4088 = vtanh.f32 %v569_v16 }
 0x3d2   :  { %4090 = vtanh.f32 %v4016_v17 }
 0x3d3   :  { %4092 = vpow2.f32 %v3257_v22 }
 0x3d4   :  { %4094 = vpow2.f32 %v3263_v23 }
 0x3d5   :  { %4096 = vpow2.f32 %v3256_v24 }
 0x3d6   :  { %4098 = vpow2.f32 %v3262_v25 }
 0x3d9   :  { %v4085_v18 = vpop.eup %4084 }
 0x3da   :  { %591 = vrot.lane.b32.xlu1 %v4085_v18, %s4374_s0  ;;  %v4087_v19 = vpop.eup %4086 }
 0x3db   :  { %v4089_v20 = vpop.eup %4088 }
 0x3dc   :  { %589 = vrot.lane.b32.xlu0 %v4089_v20, %s4374_s0  ;;  %v4091_v21 = vpop.eup %4090 }
 0x3dd   :  { %v4093_v27 = vpop.eup %4092 }
 0x3de   :  { %809 = vrot.lane.b32.xlu1 %v4087_v19, %s4374_s0  ;;  %v578_v28 = vadd.f32 1.0, %v4093_v27  ;;  %v4095_v29 = vpop.eup %4094 }
 0x3df   :  { %v4097_v30 = vpop.eup %4096  ;;  %v796_v31 = vadd.f32 1.0, %v4095_v29 }
 0x3e0   :  { %807 = vrot.lane.b32.xlu0 %v4091_v21, %s4374_s0  ;;  %4100 = vrcp.f32 %v578_v28  ;;  %v577_v32 = vadd.f32 1.0, %v4097_v30  ;;  %v4099_v33 = vpop.eup %4098 }
 0x3e1   :  { %4102 = vrcp.f32 %v796_v31  ;;  %v795_v34 = vadd.f32 1.0, %v4099_v33 }
 0x3e2   :  { %4104 = vrcp.f32 %v577_v32 }
 0x3e3   :  { %4106 = vrcp.f32 %v795_v34 }
 0x3ea   :  { %v4101_v35 = vpop.eup %4100 }
 0x3eb   :  { %v4103_v38 = vpop.eup %4102  ;;  %v586_v48 = vmul.f32 0.0, %v4101_v35 }
 0x3ec   :  { %v4105_v40 = vpop.eup %4104  ;;  %v804_v52 = vmul.f32 %v4103_v38, %v4514_v50 }
 0x3ed   :  { %v4107_v44 = vpop.eup %4106  ;;  %v585_v53 = vmul.f32 0.0, %v4105_v40 }
 0x3ee   :  { %v803_v61 = vmul.f32 %v4107_v44, %v4511_v47 }
 0x44c   :  { %v592_v36 = vpop.permute.xlu1 %591 }
 0x44d   :  { %v596_v37 = vmul.f32 %v4101_v35, %v592_v36 }
 0x44e   :  { %v590_v41 = vpop.permute.xlu0 %589 }
 0x44f   :  { %601 = vrot.lane.b32.xlu1 %v596_v37, %s4374_s0  ;;  %v595_v43 = vmul.f32 %v4105_v40, %v590_v41 }
 0x450   :  { %v810_v39 = vpop.permute.xlu1 %809 }
 0x451   :  { %v814_v42 = vmul.f32 %v4103_v38, %v810_v39  ;;  %599 = vrot.lane.b32.xlu0 %v595_v43, %s4374_s0 }
 0x452   :  { %v808_v45 = vpop.permute.xlu0 %807 }
 0x453   :  { %819 = vrot.lane.b32.xlu1 %v814_v42, %s4374_s0  ;;  %v813_v46 = vmul.f32 %v4107_v44, %v808_v45 }
 0x455   :  { %817 = vrot.lane.b32.xlu0 %v813_v46, %s4374_s0 }
 0x4c1   :  { %v602_v49 = vpop.permute.xlu1 %601 }
 0x4c2   :  { %v4592_v51 = vadd.f32 %v602_v49, %v586_v48 }
 0x4c3   :  { %v600_v57 = vpop.permute.xlu0 %599 }
 0x4c4   :  { %4108 = vtanh.f32 %v4592_v51  ;;  %v4598_v60 = vadd.f32 %v600_v57, %v585_v53 }
 0x4c5   :  { %v820_v55 = vpop.permute.xlu1 %819 }
 0x4c6   :  { %v4596_v58 = vadd.f32 %v820_v55, %v804_v52 }
 0x4c7   :  { %v818_v62 = vpop.permute.xlu0 %817 }
 0x4c8   :  { %4110 = vtanh.f32 %v4596_v58  ;;  %v4603_v63 = vadd.f32 %v818_v62, %v803_v61 }
 0x4c9   :  { %4112 = vtanh.f32 %v4598_v60 }
 0x4ca   :  { %4114 = vtanh.f32 %v4603_v63 }
 0x4ce   :  { %v4109_v1 = vpop.eup %4108 }
 0x4cf   :  { %613 = vrot.lane.b32.xlu1 %v4109_v1, %s4374_s0 }
 0x4d2   :  { %v4111_v50 = vpop.eup %4110 }
 0x4d3   :  { %v4113_v2 = vpop.eup %4112  ;;  %831 = vrot.lane.b32.xlu1 %v4111_v50, %s4374_s0 }
 0x4d4   :  { %611 = vrot.lane.b32.xlu0 %v4113_v2, %s4374_s0  ;;  %v4115_v3 = vpop.eup %4114 }
 0x4d8   :  { %829 = vrot.lane.b32.xlu0 %v4115_v3, %s4374_s0 }
 0x541   :  { %v614_v4 = vpop.permute.xlu1 %613 }
 0x542   :  { %v4610_v5 = vmul.f32 %v4101_v35, %v614_v4 }
 0x544   :  { %704 = vrot.lane.b32.xlu1 %v4610_v5, %s4375_s22 }
 0x545   :  { %v832_v47 = vpop.permute.xlu1 %831 }
 0x546   :  { %v612_v6 = vpop.permute.xlu0 %611  ;;  %v836_v9 = vmul.f32 %v4103_v38, %v832_v47 }
 0x547   :  { %v4614_v10 = vmul.f32 %v4105_v40, %v612_v6 }
 0x548   :  { %841 = vrot.lane.b32.xlu1 %v836_v9, %s4375_s22 }
 0x549   :  { %702 = vrot.lane.b32.xlu0 %v4614_v10, %s4375_s22 }
 0x54a   :  { %v830_v11 = vpop.permute.xlu0 %829 }
 0x54b   :  { %v835_v13 = vmul.f32 %v4107_v44, %v830_v11 }
 0x54d   :  { %839 = vrot.lane.b32.xlu0 %v835_v13, %s4375_s22 }
 0x5b6   :  { %v705_v14 = vpop.permute.xlu1 %704 }
 0x5ba   :  { %v842_v17 = vpop.permute.xlu1 %841 }
 0x5bb   :  { %v703_v15 = vpop.permute.xlu0 %702 }
 0x5bc   :  { %3586 = vmatprep.mubr.msk.f32.mxu1 %vm274_vm1, %v703_v15 }
 0x5bd   :  { %3587 = vmatmul.mubr.msk.f32.vlgmr.msra.gmra.mrb[2].mxu1 %vm274_vm1, %v705_v14 }
 0x5be   :  { %3856 = vmatpush3.bf16.msra.mxu1 %v4542_v59 }
 0x5bf   :  { %v840_v16 = vpop.permute.xlu0 %839  ;;  %3858 = vmatprep.subr.bf16.mxu1 %v4556_v0 }
 0x5c0   :  { %3597 = vmatprep.mubr.msk.f32.mxu1 %vm274_vm1, %v840_v16  ;;  %3608 = vmatprep.mubr.msk.f32.mxu0 %vm274_vm1, %v840_v16 }
 0x5c1   :  { %3609 = vmatmul.mubr.msk.f32.vlgmr.msra.gmra.mrb[4].mxu0 %vm274_vm1, %v842_v17 }
 0x5c2   :  { %3860 = vmatpush3.bf16.msra.mxu1 %v4556_v0  ;;  %3888 = vmatpush3.bf16.msra.mxu0 %v4419_v7 }
 0x5c3   :  { %3870 = vmatprep.subr.bf16.mxu1 %v4526_v54  ;;  %3890 = vmatprep.subr.bf16.mxu0 %v4434_v12 }
 0x5c5   :  { %3598 = vmatmul.mubr.msk.f32.vlgmr.msra.gmra.mrb[2].mxu1 %vm274_vm1, %v842_v17  ;;  %v973_v17 = vstv %s3268_s26 }
 0x5c6   :  { %3872 = vmatpush3.bf16.msra.mxu1 %v4526_v54  ;;  %3892 = vmatpush3.bf16.msra.mxu0 %v4434_v12 }
 0x5c7   :  { %3874 = vmatprep.subr.bf16.mxu1 %v4531_v56  ;;  %3910 = vmatprep.subr.bf16.mxu0 %v4419_v7 }
 0x5ca   :  { %3876 = vmatpush3.bf16.msra.mxu1 %v4531_v56 }
 0x5cb   :  { %3878 = vmatprep.subr.bf16.mxu1 %v4542_v59 }
 0x694   :  { %v3610_v18 = vpop.f32.mrb[4].mxu0 }
 0x695   :  { %v1044_v19 = vpop.f32.mrb[5].mxu0  ;;  %v4017_v24 = vadd.f32 %v3610_v18, %v4503_v26 }
 0x696   :  { %v4018_v25 = vadd.f32 %v4503_v26, %v1044_v19 }
 0x697   :  { %v3274_v33 = vmul.f32 -1.442695, %v4017_v24 }
 0x698   :  { %v3599_v20 = vpop.f32.mrb[2].mxu1  ;;  %v3273_v34 = vmul.f32 -1.442695, %v4018_v25 }
 0x699   :  { %v923_v21 = vadd.f32 %v3599_v20, %v4578_v8  ;;  %v913_v22 = vpop.f32.mrb[3].mxu1 }
 0x69a   :  { %v922_v23 = vadd.f32 %v4578_v8, %v913_v22 }
 0x69b   :  { %4116 = vtanh.f32 %v923_v21  ;;  %v3267_v31 = vmul.f32 -1.442695, %v923_v21 }
 0x69c   :  { %4118 = vtanh.f32 %v922_v23  ;;  %v3266_v32 = vmul.f32 -1.442695, %v922_v23 }
 0x69d   :  { %4120 = vtanh.f32 %v4017_v24 }
 0x69e   :  { %4122 = vtanh.f32 %v4018_v25 }
 0x69f   :  { %4124 = vpow2.f32 %v3267_v31 }
 0x6a0   :  { %4126 = vpow2.f32 %v3266_v32 }
 0x6a1   :  { %4128 = vpow2.f32 %v3274_v33 }
 0x6a2   :  { %4130 = vpow2.f32 %v3273_v34 }
 0x6a5   :  { %v4117_v27 = vpop.eup %4116 }
 0x6a6   :  { %v4119_v28 = vpop.eup %4118  ;;  %944 = vrot.lane.b32.xlu1 %v4117_v27, %s4374_s0 }
 0x6a7   :  { %942 = vrot.lane.b32.xlu0 %v4119_v28, %s4374_s0  ;;  %v4121_v29 = vpop.eup %4120 }
 0x6a8   :  { %v4123_v30 = vpop.eup %4122 }
 0x6a9   :  { %v4125_v35 = vpop.eup %4124 }
 0x6aa   :  { %1162 = vrot.lane.b32.xlu1 %v4121_v29, %s4374_s0  ;;  %v4127_v36 = vpop.eup %4126  ;;  %v931_v37 = vadd.f32 1.0, %v4125_v35 }
 0x6ab   :  { %1160 = vrot.lane.b32.xlu0 %v4123_v30, %s4374_s0  ;;  %v4129_v38 = vpop.eup %4128  ;;  %v930_v39 = vadd.f32 1.0, %v4127_v36 }
 0x6ac   :  { %v4131_v40 = vpop.eup %4130  ;;  %v1149_v41 = vadd.f32 1.0, %v4129_v38  ;;  %4132 = vrcp.f32 %v931_v37 }
 0x6ad   :  { %v1148_v42 = vadd.f32 1.0, %v4131_v40  ;;  %4134 = vrcp.f32 %v930_v39 }
 0x6ae   :  { %4136 = vrcp.f32 %v1149_v41 }
 0x6af   :  { %4138 = vrcp.f32 %v1148_v42 }
 0x6b6   :  { %v4133_v43 = vpop.eup %4132 }
 0x6b7   :  { %v4135_v45 = vpop.eup %4134  ;;  %v939_v1 = vmul.f32 %v4133_v43, %v4592_v51 }
 0x6b8   :  { %v4137_v52 = vpop.eup %4136  ;;  %v938_v2 = vmul.f32 %v4135_v45, %v4598_v60 }
 0x6b9   :  { %v4139_v55 = vpop.eup %4138  ;;  %v1157_v6 = vmul.f32 %v4137_v52, %v4596_v58 }
 0x6ba   :  { %v1156_v11 = vmul.f32 %v4139_v55, %v4603_v63  ;;  %v620_v63 = vstv %s619_s25 }
 0x6bb   :  { %v622_v22 = vmul.f32 %v620_v63, %v4610_v5  ;;  %v621_v24 = vmul.f32 %v620_v63, %v4614_v10 }
 0x718   :  { %v945_v44 = vpop.permute.xlu1 %944 }
 0x719   :  { %v949_v46 = vmul.f32 %v4133_v43, %v945_v44  ;;  %v943_v48 = vpop.permute.xlu0 %942 }
 0x71a   :  { %v948_v49 = vmul.f32 %v4135_v45, %v943_v48 }
 0x71b   :  { %954 = vrot.lane.b32.xlu1 %v949_v46, %s4374_s0 }
 0x71c   :  { %v1163_v53 = vpop.permute.xlu1 %1162  ;;  %952 = vrot.lane.b32.xlu0 %v948_v49, %s4374_s0 }
 0x71d   :  { %v1167_v57 = vmul.f32 %v4137_v52, %v1163_v53  ;;  %v1161_v61 = vpop.permute.xlu0 %1160 }
 0x71e   :  { %v1166_v62 = vmul.f32 %v4139_v55, %v1161_v61 }
 0x71f   :  { %1172 = vrot.lane.b32.xlu1 %v1167_v57, %s4374_s0 }
 0x720   :  { %1170 = vrot.lane.b32.xlu0 %v1166_v62, %s4374_s0 }
 0x78d   :  { %v955_v50 = vpop.permute.xlu1 %954 }
 0x78e   :  { %v4652_v3 = vadd.f32 %v955_v50, %v939_v1  ;;  %v953_v4 = vpop.permute.xlu0 %952 }
 0x78f   :  { %v4654_v47 = vadd.f32 %v953_v4, %v938_v2 }
 0x790   :  { %4140 = vtanh.f32 %v4652_v3 }
 0x791   :  { %4142 = vtanh.f32 %v4654_v47  ;;  %v1173_v9 = vpop.permute.xlu1 %1172 }
 0x792   :  { %v4660_v13 = vadd.f32 %v1173_v9, %v1157_v6  ;;  %v1171_v51 = vpop.permute.xlu0 %1170 }
 0x793   :  { %v4662_v14 = vadd.f32 %v1171_v51, %v1156_v11 }
 0x794   :  { %4144 = vtanh.f32 %v4660_v13 }
 0x795   :  { %4146 = vtanh.f32 %v4662_v14 }
 0x79a   :  { %v4141_v60 = vpop.eup %4140 }
 0x79b   :  { %v4143_v15 = vpop.eup %4142  ;;  %966 = vrot.lane.b32.xlu1 %v4141_v60, %s4374_s0 }
 0x79c   :  { %964 = vrot.lane.b32.xlu0 %v4143_v15, %s4374_s0 }
 0x79e   :  { %v4145_v58 = vpop.eup %4144 }
 0x79f   :  { %v4147_v16 = vpop.eup %4146  ;;  %1184 = vrot.lane.b32.xlu1 %v4145_v58, %s4374_s0 }
 0x7a0   :  { %1182 = vrot.lane.b32.xlu0 %v4147_v16, %s4374_s0 }
 0x80d   :  { %v967_v18 = vpop.permute.xlu1 %966 }
 0x80e   :  { %v971_v19 = vmul.f32 %v4133_v43, %v967_v18  ;;  %v965_v20 = vpop.permute.xlu0 %964 }
 0x80f   :  { %v970_v21 = vmul.f32 %v4135_v45, %v965_v20 }
 0x810   :  { %v975_v23 = vmul.f32 %v973_v17, %v971_v19  ;;  %1057 = vrot.lane.b32.xlu1 %v971_v19, %s4375_s22 }
 0x811   :  { %v974_v25 = vmul.f32 %v973_v17, %v970_v21  ;;  %v1185_v27 = vpop.permute.xlu1 %1184  ;;  %1055 = vrot.lane.b32.xlu0 %v970_v21, %s4375_s22 }
 0x812   :  { %v4674_v28 = vadd.f32 %v975_v23, %v622_v22  ;;  %v1189_v29 = vmul.f32 %v4137_v52, %v1185_v27  ;;  %v1183_v30 = vpop.permute.xlu0 %1182 }
 0x813   :  { %v4676_v31 = vadd.f32 %v974_v25, %v621_v24  ;;  %v1188_v32 = vmul.f32 %v4139_v55, %v1183_v30 }
 0x814   :  { %1194 = vrot.lane.b32.xlu1 %v1189_v29, %s4375_s22 }
 0x815   :  { %1192 = vrot.lane.b32.xlu0 %v1188_v32, %s4375_s22 }
 0x882   :  { %v1058_v5 = vpop.permute.xlu1 %1057 }
 0x883   :  { %v1056_v33 = vpop.permute.xlu0 %1055 }
 0x884   :  { %3619 = vmatprep.mubr.msk.f32.mxu1 %vm274_vm1, %v1056_v33 }
 0x885   :  { %3620 = vmatmul.mubr.msk.f32.vlgmr.msra.gmra.mrb[4].mxu1 %vm274_vm1, %v1058_v5 }
 0x886   :  { %3880 = vmatpush3.bf16.msra.mxu1 %v4542_v59  ;;  %v1195_v34 = vpop.permute.xlu1 %1194 }
 0x887   :  { %v1193_v10 = vpop.permute.xlu0 %1192  ;;  %3882 = vmatprep.subr.bf16.mxu1 %v4556_v0 }
 0x888   :  { %3630 = vmatprep.mubr.msk.f32.mxu1 %vm274_vm1, %v1193_v10  ;;  %3641 = vmatprep.mubr.msk.f32.mxu0 %vm274_vm1, %v1193_v10 }
 0x889   :  { %3642 = vmatmul.mubr.msk.f32.vlgmr.msra.gmra.mrb[6].mxu0 %vm274_vm1, %v1195_v34 }
 0x88a   :  { %3884 = vmatpush3.bf16.msra.mxu1 %v4556_v0  ;;  %3912 = vmatpush3.bf16.msra.mxu0 %v4419_v7 }
 0x88b   :  { %3894 = vmatprep.subr.bf16.mxu1 %v4526_v54  ;;  %3914 = vmatprep.subr.bf16.mxu0 %v4434_v12 }
 0x88d   :  { %3631 = vmatmul.mubr.msk.f32.vlgmr.msra.gmra.mrb[4].mxu1 %vm274_vm1, %v1195_v34 }
 0x88e   :  { %3896 = vmatpush3.bf16.msra.mxu1 %v4526_v54  ;;  %3916 = vmatpush3.bf16.msra.mxu0 %v4434_v12 }
 0x88f   :  { %3898 = vmatprep.subr.bf16.mxu1 %v4531_v56  ;;  %3934 = vmatprep.subr.bf16.mxu0 %v4419_v7 }
 0x892   :  { %3900 = vmatpush3.bf16.msra.mxu1 %v4531_v56 }
 0x893   :  { %3902 = vmatprep.subr.bf16.mxu1 %v4542_v59 }
 0x95c   :  { %v3643_v35 = vpop.f32.mrb[6].mxu0 }
 0x95d   :  { %v1397_v36 = vpop.f32.mrb[7].mxu0  ;;  %v4019_v41 = vadd.f32 %v3643_v35, %v4503_v26 }
 0x95e   :  { %v4020_v42 = vadd.f32 %v4503_v26, %v1397_v36 }
 0x95f   :  { %v3285_v52 = vmul.f32 -1.442695, %v4019_v41 }
 0x960   :  { %v3632_v37 = vpop.f32.mrb[4].mxu1  ;;  %v3284_v53 = vmul.f32 -1.442695, %v4020_v42 }
 0x961   :  { %v1276_v38 = vadd.f32 %v3632_v37, %v4578_v8  ;;  %v1266_v39 = vpop.f32.mrb[5].mxu1 }
 0x962   :  { %v1275_v40 = vadd.f32 %v4578_v8, %v1266_v39 }
 0x963   :  { %4148 = vtanh.f32 %v1276_v38  ;;  %v3278_v48 = vmul.f32 -1.442695, %v1276_v38 }
 0x964   :  { %4150 = vtanh.f32 %v1275_v40  ;;  %v3277_v49 = vmul.f32 -1.442695, %v1275_v40 }
 0x965   :  { %4152 = vtanh.f32 %v4019_v41 }
 0x966   :  { %4154 = vtanh.f32 %v4020_v42 }
 0x967   :  { %4156 = vpow2.f32 %v3278_v48 }
 0x968   :  { %4158 = vpow2.f32 %v3277_v49 }
 0x969   :  { %4160 = vpow2.f32 %v3285_v52 }
 0x96a   :  { %4162 = vpow2.f32 %v3284_v53 }
 0x96d   :  { %v4149_v43 = vpop.eup %4148 }
 0x96e   :  { %v4151_v44 = vpop.eup %4150  ;;  %1297 = vrot.lane.b32.xlu1 %v4149_v43, %s4374_s0 }
 0x96f   :  { %1295 = vrot.lane.b32.xlu0 %v4151_v44, %s4374_s0  ;;  %v4153_v45 = vpop.eup %4152 }
 0x970   :  { %v4155_v46 = vpop.eup %4154 }
 0x971   :  { %v4157_v55 = vpop.eup %4156 }
 0x972   :  { %1515 = vrot.lane.b32.xlu1 %v4153_v45, %s4374_s0  ;;  %v4159_v57 = vpop.eup %4158  ;;  %v1284_v61 = vadd.f32 1.0, %v4157_v55 }
 0x973   :  { %1513 = vrot.lane.b32.xlu0 %v4155_v46, %s4374_s0  ;;  %v4161_v62 = vpop.eup %4160  ;;  %v1283_v1 = vadd.f32 1.0, %v4159_v57 }
 0x974   :  { %v4163_v50 = vpop.eup %4162  ;;  %v1502_v2 = vadd.f32 1.0, %v4161_v62  ;;  %4164 = vrcp.f32 %v1284_v61 }
 0x975   :  { %v1501_v4 = vadd.f32 1.0, %v4163_v50  ;;  %4166 = vrcp.f32 %v1283_v1 }
 0x976   :  { %4168 = vrcp.f32 %v1502_v2 }
 0x977   :  { %4170 = vrcp.f32 %v1501_v4 }
 0x97e   :  { %v4165_v6 = vpop.eup %4164 }
 0x97f   :  { %v4167_v11 = vpop.eup %4166  ;;  %v1292_v20 = vmul.f32 %v4165_v6, %v4652_v3 }
 0x980   :  { %v4169_v58 = vpop.eup %4168  ;;  %v1291_v22 = vmul.f32 %v4167_v11, %v4654_v47 }
 0x981   :  { %v4171_v63 = vpop.eup %4170  ;;  %v1510_v27 = vmul.f32 %v4169_v58, %v4660_v13 }
 0x982   :  { %v1509_v30 = vmul.f32 %v4171_v63, %v4662_v14  ;;  %v1326_v14 = vstv %s3279_s27 }
 0x9e0   :  { %v1298_v9 = vpop.permute.xlu1 %1297 }
 0x9e1   :  { %v1302_v51 = vmul.f32 %v4165_v6, %v1298_v9  ;;  %v1296_v60 = vpop.permute.xlu0 %1295 }
 0x9e2   :  { %v1301_v15 = vmul.f32 %v4167_v11, %v1296_v60 }
 0x9e3   :  { %1307 = vrot.lane.b32.xlu1 %v1302_v51, %s4374_s0 }
 0x9e4   :  { %v1516_v16 = vpop.permute.xlu1 %1515  ;;  %1305 = vrot.lane.b32.xlu0 %v1301_v15, %s4374_s0 }
 0x9e5   :  { %v1520_v17 = vmul.f32 %v4169_v58, %v1516_v16  ;;  %v1514_v18 = vpop.permute.xlu0 %1513 }
 0x9e6   :  { %v1519_v19 = vmul.f32 %v4171_v63, %v1514_v18 }
 0x9e7   :  { %1525 = vrot.lane.b32.xlu1 %v1520_v17, %s4374_s0 }
 0x9e8   :  { %1523 = vrot.lane.b32.xlu0 %v1519_v19, %s4374_s0 }
 0xa55   :  { %v1308_v21 = vpop.permute.xlu1 %1307 }
 0xa56   :  { %v4712_v23 = vadd.f32 %v1308_v21, %v1292_v20  ;;  %v1306_v24 = vpop.permute.xlu0 %1305 }
 0xa57   :  { %v4714_v25 = vadd.f32 %v1306_v24, %v1291_v22 }
 0xa58   :  { %4172 = vtanh.f32 %v4712_v23 }
 0xa59   :  { %4174 = vtanh.f32 %v4714_v25  ;;  %v1526_v29 = vpop.permute.xlu1 %1525 }
 0xa5a   :  { %v4720_v32 = vadd.f32 %v1526_v29, %v1510_v27  ;;  %v1524_v3 = vpop.permute.xlu0 %1523 }
 0xa5b   :  { %v4722_v5 = vadd.f32 %v1524_v3, %v1509_v30 }
 0xa5c   :  { %4176 = vtanh.f32 %v4720_v32 }
 0xa5d   :  { %4178 = vtanh.f32 %v4722_v5 }
 0xa62   :  { %v4173_v47 = vpop.eup %4172 }
 0xa63   :  { %v4175_v33 = vpop.eup %4174  ;;  %1319 = vrot.lane.b32.xlu1 %v4173_v47, %s4374_s0 }
 0xa64   :  { %1317 = vrot.lane.b32.xlu0 %v4175_v33, %s4374_s0 }
 0xa66   :  { %v4177_v13 = vpop.eup %4176 }
 0xa67   :  { %v4179_v10 = vpop.eup %4178  ;;  %1537 = vrot.lane.b32.xlu1 %v4177_v13, %s4374_s0 }
 0xa68   :  { %1535 = vrot.lane.b32.xlu0 %v4179_v10, %s4374_s0 }
 0xad5   :  { %v1320_v34 = vpop.permute.xlu1 %1319 }
 0xad6   :  { %v1324_v35 = vmul.f32 %v4165_v6, %v1320_v34  ;;  %v1318_v36 = vpop.permute.xlu0 %1317 }
 0xad7   :  { %v1323_v37 = vmul.f32 %v4167_v11, %v1318_v36 }
 0xad8   :  { %v1328_v38 = vmul.f32 %v1326_v14, %v1324_v35  ;;  %1410 = vrot.lane.b32.xlu1 %v1324_v35, %s4375_s22 }
 0xad9   :  { %v1327_v39 = vmul.f32 %v1326_v14, %v1323_v37  ;;  %v1538_v40 = vpop.permute.xlu1 %1537  ;;  %1408 = vrot.lane.b32.xlu0 %v1323_v37, %s4375_s22 }
 0xada   :  { %v4733_v41 = vadd.f32 %v1328_v38, %v4674_v28  ;;  %v1542_v42 = vmul.f32 %v4169_v58, %v1538_v40  ;;  %v1536_v43 = vpop.permute.xlu0 %1535 }
 0xadb   :  { %v4736_v44 = vadd.f32 %v1327_v39, %v4676_v31  ;;  %v1541_v45 = vmul.f32 %v4171_v63, %v1536_v43 }
 0xadc   :  { %1547 = vrot.lane.b32.xlu1 %v1542_v42, %s4375_s22 }
 0xadd   :  { %1545 = vrot.lane.b32.xlu0 %v1541_v45, %s4375_s22 }
 0xb4a   :  { %v1411_v46 = vpop.permute.xlu1 %1410 }
 0xb4b   :  { %v1409_v48 = vpop.permute.xlu0 %1408 }
 0xb4c   :  { %3652 = vmatprep.mubr.msk.f32.mxu1 %vm274_vm1, %v1409_v48 }
 0xb4d   :  { %3653 = vmatmul.mubr.msk.f32.vlgmr.msra.gmra.mrb[6].mxu1 %vm274_vm1, %v1411_v46 }
 0xb4e   :  { %3904 = vmatpush3.bf16.msra.mxu1 %v4542_v59  ;;  %v1548_v49 = vpop.permute.xlu1 %1547 }
 0xb4f   :  { %v1546_v28 = vpop.permute.xlu0 %1545  ;;  %3906 = vmatprep.subr.bf16.mxu1 %v4556_v0 }
 0xb50   :  { %3663 = vmatprep.mubr.msk.f32.mxu1 %vm274_vm1, %v1546_v28  ;;  %3674 = vmatprep.mubr.msk.f32.mxu0 %vm274_vm1, %v1546_v28 }
 0xb51   :  { %3675 = vmatmul.mubr.msk.f32.vlgmr.msra.gmra.mrb[8].mxu0 %vm274_vm1, %v1548_v49 }
 0xb52   :  { %3908 = vmatpush3.bf16.msra.mxu1 %v4556_v0  ;;  %3936 = vmatpush3.bf16.msra.mxu0 %v4419_v7 }
 0xb53   :  { %3918 = vmatprep.subr.bf16.mxu1 %v4526_v54  ;;  %3938 = vmatprep.subr.bf16.mxu0 %v4434_v12 }
 0xb55   :  { %3664 = vmatmul.mubr.msk.f32.vlgmr.msra.gmra.mrb[6].mxu1 %vm274_vm1, %v1548_v49 }
 0xb56   :  { %3920 = vmatpush3.bf16.msra.mxu1 %v4526_v54  ;;  %3940 = vmatpush3.bf16.msra.mxu0 %v4434_v12 }
 0xb57   :  { %3922 = vmatprep.subr.bf16.mxu1 %v4531_v56  ;;  %3942 = vmatprep.subr.bf16.mxu0 %v4526_v54 }
 0xb5a   :  { %3924 = vmatpush3.bf16.msra.mxu1 %v4531_v56 }
 0xb5b   :  { %3926 = vmatprep.subr.bf16.mxu1 %v4542_v59 }
 0xc24   :  { %v3676_v31 = vpop.f32.mrb[8].mxu0 }
 0xc25   :  { %v1750_v52 = vpop.f32.mrb[9].mxu0  ;;  %v4021_v62 = vadd.f32 %v3676_v31, %v4503_v26 }
 0xc26   :  { %v4022_v1 = vadd.f32 %v4503_v26, %v1750_v52 }
 0xc27   :  { %v3296_v51 = vmul.f32 -1.442695, %v4021_v62 }
 0xc28   :  { %v3665_v53 = vpop.f32.mrb[6].mxu1  ;;  %v3295_v26 = vmul.f32 -1.442695, %v4022_v1 }
 0xc29   :  { %v1629_v55 = vadd.f32 %v3665_v53, %v4578_v8  ;;  %v1619_v57 = vpop.f32.mrb[7].mxu1 }
 0xc2a   :  { %v1628_v61 = vadd.f32 %v4578_v8, %v1619_v57 }
 0xc2b   :  { %4180 = vtanh.f32 %v1629_v55  ;;  %v3289_v9 = vmul.f32 -1.442695, %v1629_v55 }
 0xc2c   :  { %4182 = vtanh.f32 %v1628_v61  ;;  %v3288_v11 = vmul.f32 -1.442695, %v1628_v61 }
 0xc2d   :  { %4184 = vtanh.f32 %v4021_v62 }
 0xc2e   :  { %4186 = vtanh.f32 %v4022_v1 }
 0xc2f   :  { %4188 = vpow2.f32 %v3289_v9 }
 0xc30   :  { %4190 = vpow2.f32 %v3288_v11 }
 0xc31   :  { %4192 = vpow2.f32 %v3296_v51 }
 0xc32   :  { %4194 = vpow2.f32 %v3295_v26 }
 0xc35   :  { %v4181_v50 = vpop.eup %4180 }
 0xc36   :  { %v4183_v2 = vpop.eup %4182  ;;  %1650 = vrot.lane.b32.xlu1 %v4181_v50, %s4374_s0 }
 0xc37   :  { %1648 = vrot.lane.b32.xlu0 %v4183_v2, %s4374_s0  ;;  %v4185_v4 = vpop.eup %4184 }
 0xc38   :  { %v4187_v6 = vpop.eup %4186 }
 0xc39   :  { %v4189_v60 = vpop.eup %4188 }
 0xc3a   :  { %1868 = vrot.lane.b32.xlu1 %v4185_v4, %s4374_s0  ;;  %v4191_v15 = vpop.eup %4190  ;;  %v1637_v58 = vadd.f32 1.0, %v4189_v60 }
 0xc3b   :  { %1866 = vrot.lane.b32.xlu0 %v4187_v6, %s4374_s0  ;;  %v4193_v16 = vpop.eup %4192  ;;  %v1636_v63 = vadd.f32 1.0, %v4191_v15 }
 0xc3c   :  { %v4195_v17 = vpop.eup %4194  ;;  %v1855_v18 = vadd.f32 1.0, %v4193_v16  ;;  %4196 = vrcp.f32 %v1637_v58  ;;  %v4823_v58 = vld [vmem:[%s5035_s1 + $0x30] ss:$0 sm:$0xff] }
 0xc3d   :  { %v1854_v19 = vadd.f32 1.0, %v4195_v17  ;;  %4198 = vrcp.f32 %v1636_v63 }
 0xc3e   :  { %4200 = vrcp.f32 %v1855_v18 }
 0xc3f   :  { %4202 = vrcp.f32 %v1854_v19 }
 0xc46   :  { %v4197_v20 = vpop.eup %4196 }
 0xc47   :  { %v4199_v22 = vpop.eup %4198  ;;  %v1645_v14 = vmul.f32 %v4197_v20, %v4712_v23 }
 0xc48   :  { %v4201_v30 = vpop.eup %4200  ;;  %v1644_v35 = vmul.f32 %v4199_v22, %v4714_v25 }
 0xc49   :  { %v4203_v47 = vpop.eup %4202  ;;  %v1863_v39 = vmul.f32 %v4201_v30, %v4720_v32 }
 0xc4a   :  { %v1862_v42 = vmul.f32 %v4203_v47, %v4722_v5  ;;  %v1679_v5 = vstv %s3290_s28 }
 0xca8   :  { %v1651_v21 = vpop.permute.xlu1 %1650 }
 0xca9   :  { %v1655_v24 = vmul.f32 %v4197_v20, %v1651_v21  ;;  %v1649_v27 = vpop.permute.xlu0 %1648 }
 0xcaa   :  { %v1654_v29 = vmul.f32 %v4199_v22, %v1649_v27 }
 0xcab   :  { %1660 = vrot.lane.b32.xlu1 %v1655_v24, %s4374_s0 }
 0xcac   :  { %v1869_v3 = vpop.permute.xlu1 %1868  ;;  %1658 = vrot.lane.b32.xlu0 %v1654_v29, %s4374_s0 }
 0xcad   :  { %v1873_v33 = vmul.f32 %v4201_v30, %v1869_v3  ;;  %v1867_v13 = vpop.permute.xlu0 %1866 }
 0xcae   :  { %v1872_v10 = vmul.f32 %v4203_v47, %v1867_v13 }
 0xcaf   :  { %1878 = vrot.lane.b32.xlu1 %v1873_v33, %s4374_s0 }
 0xcb0   :  { %1876 = vrot.lane.b32.xlu0 %v1872_v10, %s4374_s0 }
 0xd1d   :  { %v1661_v34 = vpop.permute.xlu1 %1660 }
 0xd1e   :  { %v4772_v36 = vadd.f32 %v1661_v34, %v1645_v14  ;;  %v1659_v37 = vpop.permute.xlu0 %1658 }
 0xd1f   :  { %v4774_v38 = vadd.f32 %v1659_v37, %v1644_v35 }
 0xd20   :  { %4204 = vtanh.f32 %v4772_v36 }
 0xd21   :  { %4206 = vtanh.f32 %v4774_v38  ;;  %v1879_v40 = vpop.permute.xlu1 %1878 }
 0xd22   :  { %v4780_v43 = vadd.f32 %v1879_v40, %v1863_v39  ;;  %v1877_v23 = vpop.permute.xlu0 %1876 }
 0xd23   :  { %v4782_v45 = vadd.f32 %v1877_v23, %v1862_v42 }
 0xd24   :  { %4208 = vtanh.f32 %v4780_v43 }
 0xd25   :  { %4210 = vtanh.f32 %v4782_v45 }
 0xd2a   :  { %v4205_v25 = vpop.eup %4204 }
 0xd2b   :  { %v4207_v46 = vpop.eup %4206  ;;  %1672 = vrot.lane.b32.xlu1 %v4205_v25, %s4374_s0 }
 0xd2c   :  { %1670 = vrot.lane.b32.xlu0 %v4207_v46, %s4374_s0 }
 0xd2e   :  { %v4209_v32 = vpop.eup %4208 }
 0xd2f   :  { %v4211_v48 = vpop.eup %4210  ;;  %1890 = vrot.lane.b32.xlu1 %v4209_v32, %s4374_s0 }
 0xd30   :  { %1888 = vrot.lane.b32.xlu0 %v4211_v48, %s4374_s0 }
 0xd9d   :  { %v1673_v28 = vpop.permute.xlu1 %1672 }
 0xd9e   :  { %v1677_v49 = vmul.f32 %v4197_v20, %v1673_v28  ;;  %v1671_v31 = vpop.permute.xlu0 %1670 }
 0xd9f   :  { %v1676_v52 = vmul.f32 %v4199_v22, %v1671_v31 }
 0xda0   :  { %v1681_v53 = vmul.f32 %v1679_v5, %v1677_v49  ;;  %1763 = vrot.lane.b32.xlu1 %v1677_v49, %s4375_s22 }
 0xda1   :  { %v1680_v55 = vmul.f32 %v1679_v5, %v1676_v52  ;;  %v1891_v57 = vpop.permute.xlu1 %1890  ;;  %1761 = vrot.lane.b32.xlu0 %v1676_v52, %s4375_s22 }
 0xda2   :  { %v4793_v61 = vadd.f32 %v1681_v53, %v4733_v41  ;;  %v1895_v62 = vmul.f32 %v4201_v30, %v1891_v57  ;;  %v1889_v1 = vpop.permute.xlu0 %1888 }
 0xda3   :  { %v4796_v50 = vadd.f32 %v1680_v55, %v4736_v44  ;;  %v1894_v2 = vmul.f32 %v4203_v47, %v1889_v1 }
 0xda4   :  { %1900 = vrot.lane.b32.xlu1 %v1895_v62, %s4375_s22 }
 0xda5   :  { %1898 = vrot.lane.b32.xlu0 %v1894_v2, %s4375_s22 }
 0xe12   :  { %v1764_v4 = vpop.permute.xlu1 %1763 }
 0xe13   :  { %v1762_v6 = vpop.permute.xlu0 %1761 }
 0xe14   :  { %3685 = vmatprep.mubr.msk.f32.mxu1 %vm274_vm1, %v1762_v6 }
 0xe15   :  { %3686 = vmatmul.mubr.msk.f32.vlgmr.msra.gmra.mrb[8].mxu1 %vm274_vm1, %v1764_v4 }
 0xe16   :  { %3928 = vmatpush3.bf16.msra.mxu1 %v4542_v59  ;;  %v1901_v9 = vpop.permute.xlu1 %1900 }
 0xe17   :  { %v1899_v41 = vpop.permute.xlu0 %1898  ;;  %3930 = vmatprep.subr.bf16.mxu1 %v4556_v0 }
 0xe18   :  { %3696 = vmatprep.mubr.msk.f32.mxu1 %vm274_vm1, %v1899_v41  ;;  %3707 = vmatprep.mubr.msk.f32.mxu0 %vm274_vm1, %v1899_v41 }
 0xe19   :  { %3708 = vmatmul.mubr.msk.f32.vlgmr.msra.gmra.mrb[10].mxu0 %vm274_vm1, %v1901_v9 }
 0xe1a   :  { %3932 = vmatpush3.bf16.msra.mxu1 %v4556_v0  ;;  %3944 = vmatpush3.bf16.msra.mxu0 %v4526_v54 }
 0xe1b   :  { %3946 = vmatprep.subr.bf16.mxu0 %v4531_v56  ;;  %3966 = vmatprep.subr.bf16.mxu1 %v4526_v54 }
 0xe1d   :  { %3697 = vmatmul.mubr.msk.f32.vlgmr.msra.gmra.mrb[8].mxu1 %vm274_vm1, %v1901_v9 }
 0xe1e   :  { %3948 = vmatpush3.bf16.msra.mxu0 %v4531_v56  ;;  %3968 = vmatpush3.bf16.msra.mxu1 %v4526_v54 }
 0xe1f   :  { %3950 = vmatprep.subr.bf16.mxu0 %v4542_v59  ;;  %3970 = vmatprep.subr.bf16.mxu1 %v4531_v56 }
 0xe22   :  { %3972 = vmatpush3.bf16.msra.mxu1 %v4531_v56 }
 0xe23   :  { %3974 = vmatprep.subr.bf16.mxu1 %v4542_v59 }
 0xeec   :  { %v3709_v44 = vpop.f32.mrb[10].mxu0 }
 0xeed   :  { %v2103_v11 = vpop.f32.mrb[11].mxu0  ;;  %v4023_v16 = vadd.f32 %v4823_v58, %v3709_v44 }
 0xeee   :  { %v4024_v63 = vadd.f32 %v4823_v58, %v2103_v11 }
 0xeef   :  { %v3307_v22 = vmul.f32 -1.442695, %v4023_v16 }
 0xef0   :  { %v3698_v51 = vpop.f32.mrb[8].mxu1  ;;  %v3306_v24 = vmul.f32 -1.442695, %v4024_v63 }
 0xef1   :  { %v1982_v26 = vadd.f32 %v3698_v51, %v4578_v8  ;;  %v1972_v60 = vpop.f32.mrb[9].mxu1 }
 0xef2   :  { %v1981_v15 = vadd.f32 %v4578_v8, %v1972_v60 }
 0xef3   :  { %4212 = vtanh.f32 %v1982_v26  ;;  %v3300_v20 = vmul.f32 -1.442695, %v1982_v26 }
 0xef4   :  { %4214 = vtanh.f32 %v1981_v15  ;;  %v3299_v21 = vmul.f32 -1.442695, %v1981_v15 }
 0xef5   :  { %4216 = vtanh.f32 %v4023_v16 }
 0xef6   :  { %4218 = vtanh.f32 %v4024_v63 }
 0xef7   :  { %4220 = vpow2.f32 %v3300_v20 }
 0xef8   :  { %4222 = vpow2.f32 %v3299_v21  ;;  %v4885_v21 = vld [vmem:[%s5035_s1 + $0x78] ss:$0 sm:$0xff] }
 0xef9   :  { %4224 = vpow2.f32 %v3307_v22 }
 0xefa   :  { %4226 = vpow2.f32 %v3306_v24 }
 0xefd   :  { %v4213_v17 = vpop.eup %4212 }
 0xefe   :  { %v4215_v18 = vpop.eup %4214  ;;  %2003 = vrot.lane.b32.xlu1 %v4213_v17, %s4374_s0 }
 0xeff   :  { %2001 = vrot.lane.b32.xlu0 %v4215_v18, %s4374_s0  ;;  %v4217_v8 = vpop.eup %4216 }
 0xf00   :  { %v4219_v19 = vpop.eup %4218 }
 0xf01   :  { %v4221_v27 = vpop.eup %4220 }
 0xf02   :  { %2221 = vrot.lane.b32.xlu1 %v4217_v8, %s4374_s0  ;;  %v4223_v29 = vpop.eup %4222  ;;  %v1990_v30 = vadd.f32 1.0, %v4221_v27 }
 0xf03   :  { %2219 = vrot.lane.b32.xlu0 %v4219_v19, %s4374_s0  ;;  %v4225_v3 = vpop.eup %4224  ;;  %v1989_v47 = vadd.f32 1.0, %v4223_v29 }
 0xf04   :  { %v4227_v33 = vpop.eup %4226  ;;  %v2208_v13 = vadd.f32 1.0, %v4225_v3  ;;  %4228 = vrcp.f32 %v1990_v30 }
 0xf05   :  { %v2207_v10 = vadd.f32 1.0, %v4227_v33  ;;  %4230 = vrcp.f32 %v1989_v47 }
 0xf06   :  { %4232 = vrcp.f32 %v2208_v13 }
 0xf07   :  { %4234 = vrcp.f32 %v2207_v10 }
 0xf0e   :  { %v4229_v14 = vpop.eup %4228 }
 0xf0f   :  { %v4231_v35 = vpop.eup %4230  ;;  %v1998_v5 = vmul.f32 %v4229_v14, %v4772_v36 }
 0xf10   :  { %v4233_v42 = vpop.eup %4232  ;;  %v1997_v49 = vmul.f32 %v4231_v35, %v4774_v38 }
 0xf11   :  { %v4235_v25 = vpop.eup %4234  ;;  %v2216_v55 = vmul.f32 %v4233_v42, %v4780_v43 }
 0xf12   :  { %v2215_v62 = vmul.f32 %v4235_v25, %v4782_v45  ;;  %v2032_v45 = vstv %s3301_s4 }
 0xf70   :  { %v2004_v34 = vpop.permute.xlu1 %2003 }
 0xf71   :  { %v2008_v37 = vmul.f32 %v4229_v14, %v2004_v34  ;;  %v2002_v39 = vpop.permute.xlu0 %2001 }
 0xf72   :  { %v2007_v40 = vmul.f32 %v4231_v35, %v2002_v39 }
 0xf73   :  { %2013 = vrot.lane.b32.xlu1 %v2008_v37, %s4374_s0 }
 0xf74   :  { %v2222_v23 = vpop.permute.xlu1 %2221  ;;  %2011 = vrot.lane.b32.xlu0 %v2007_v40, %s4374_s0 }
 0xf75   :  { %v2226_v46 = vmul.f32 %v4233_v42, %v2222_v23  ;;  %v2220_v32 = vpop.permute.xlu0 %2219 }
 0xf76   :  { %v2225_v48 = vmul.f32 %v4235_v25, %v2220_v32 }
 0xf77   :  { %2231 = vrot.lane.b32.xlu1 %v2226_v46, %s4374_s0 }
 0xf78   :  { %2229 = vrot.lane.b32.xlu0 %v2225_v48, %s4374_s0 }
 0xfe5   :  { %v2014_v28 = vpop.permute.xlu1 %2013 }
 0xfe6   :  { %v4837_v31 = vadd.f32 %v2014_v28, %v1998_v5  ;;  %v2012_v52 = vpop.permute.xlu0 %2011 }
 0xfe7   :  { %v4839_v53 = vadd.f32 %v2012_v52, %v1997_v49 }
 0xfe8   :  { %4236 = vtanh.f32 %v4837_v31 }
 0xfe9   :  { %4238 = vtanh.f32 %v4839_v53  ;;  %v2232_v57 = vpop.permute.xlu1 %2231 }
 0xfea   :  { %v4845_v1 = vadd.f32 %v2232_v57, %v2216_v55  ;;  %v2230_v36 = vpop.permute.xlu0 %2229 }
 0xfeb   :  { %v4847_v2 = vadd.f32 %v2230_v36, %v2215_v62 }
 0xfec   :  { %4240 = vtanh.f32 %v4845_v1 }
 0xfed   :  { %4242 = vtanh.f32 %v4847_v2 }
 0xff2   :  { %v4237_v38 = vpop.eup %4236 }
 0xff3   :  { %v4239_v4 = vpop.eup %4238  ;;  %2025 = vrot.lane.b32.xlu1 %v4237_v38, %s4374_s0 }
 0xff4   :  { %2023 = vrot.lane.b32.xlu0 %v4239_v4, %s4374_s0 }
 0xff6   :  { %v4241_v43 = vpop.eup %4240 }
 0xff7   :  { %v4243_v6 = vpop.eup %4242  ;;  %2243 = vrot.lane.b32.xlu1 %v4241_v43, %s4374_s0 }
 0xff8   :  { %2241 = vrot.lane.b32.xlu0 %v4243_v6, %s4374_s0 }
0x1065   :  { %v2026_v41 = vpop.permute.xlu1 %2025 }
0x1066   :  { %v2030_v9 = vmul.f32 %v4229_v14, %v2026_v41  ;;  %v2024_v44 = vpop.permute.xlu0 %2023 }
0x1067   :  { %v2029_v11 = vmul.f32 %v4231_v35, %v2024_v44 }
0x1068   :  { %v2034_v51 = vmul.f32 %v2032_v45, %v2030_v9  ;;  %2116 = vrot.lane.b32.xlu1 %v2030_v9, %s4375_s22 }
0x1069   :  { %v2033_v26 = vmul.f32 %v2032_v45, %v2029_v11  ;;  %v2244_v60 = vpop.permute.xlu1 %2243  ;;  %2114 = vrot.lane.b32.xlu0 %v2029_v11, %s4375_s22 }
0x106a   :  { %v4858_v15 = vadd.f32 %v2034_v51, %v4793_v61  ;;  %v2248_v16 = vmul.f32 %v4233_v42, %v2244_v60  ;;  %v2242_v63 = vpop.permute.xlu0 %2241 }
0x106b   :  { %v4861_v17 = vadd.f32 %v2033_v26, %v4796_v50  ;;  %v2247_v18 = vmul.f32 %v4235_v25, %v2242_v63 }
0x106c   :  { %2253 = vrot.lane.b32.xlu1 %v2248_v16, %s4375_s22 }
0x106d   :  { %2251 = vrot.lane.b32.xlu0 %v2247_v18, %s4375_s22 }
0x10da   :  { %v2117_v19 = vpop.permute.xlu1 %2116 }
0x10db   :  { %v2115_v8 = vpop.permute.xlu0 %2114 }
0x10dc   :  { %3718 = vmatprep.mubr.msk.f32.mxu0 %vm274_vm1, %v2115_v8 }
0x10dd   :  { %3719 = vmatmul.mubr.msk.f32.vlgmr.msra.gmra.mrb[16].mxu0 %vm274_vm1, %v2117_v19 }
0x10de   :  { %3952 = vmatpush3.bf16.msra.mxu0 %v4542_v59  ;;  %v2254_v50 = vpop.permute.xlu1 %2253 }
0x10df   :  { %v2252_v61 = vpop.permute.xlu0 %2251  ;;  %3954 = vmatprep.subr.bf16.mxu0 %v4556_v0 }
0x10e0   :  { %3729 = vmatprep.mubr.msk.f32.mxu0 %vm274_vm1, %v2252_v61 }
0x10e2   :  { %3956 = vmatpush3.bf16.msra.mxu0 %v4556_v0 }
0x10e3   :  { %3958 = vmatprep.subr.bf16.mxu0 %v4419_v7 }
0x10e5   :  { %3730 = vmatmul.mubr.msk.f32.vlgmr.msra.gmra.mrb[16].mxu0 %vm274_vm1, %v2254_v50 }
0x10e6   :  { %3960 = vmatpush3.bf16.msra.mxu0 %v4419_v7  ;;  %3740 = vmatprep.mubr.msk.f32.mxu0 %vm274_vm1, %v2252_v61 }
0x10e7   :  { %3962 = vmatprep.subr.bf16.mxu0 %v4434_v12 }
0x10ea   :  { %3964 = vmatpush3.bf16.msra.mxu0 %v4434_v12 }
0x10eb   :  { %3982 = vmatprep.subr.bf16.mxu0 %v4419_v7 }
0x10ed   :  { %3741 = vmatmul.mubr.msk.f32.vlgmr.msra.gmra.mrb[12].mxu0 %vm274_vm1, %v2254_v50 }
0x10ee   :  { %3984 = vmatpush3.bf16.msra.mxu0 %v4419_v7 }
0x10ef   :  { %3986 = vmatprep.subr.bf16.mxu0 %v4434_v12 }
0x10f2   :  { %3988 = vmatpush3.bf16.msra.mxu0 %v4434_v12 }
0x11b8   :  { %v3731_v20 = vpop.f32.mrb[16].mxu0 }
0x11b9   :  { %v2335_v22 = vadd.f32 %v4885_v21, %v3731_v20  ;;  %v2325_v24 = vpop.f32.mrb[17].mxu0 }
0x11ba   :  { %v2334_v27 = vadd.f32 %v4885_v21, %v2325_v24 }
0x11bb   :  { %4244 = vtanh.f32 %v2335_v22  ;;  %v3311_v10 = vmul.f32 -1.442695, %v2335_v22 }
0x11bc   :  { %4246 = vtanh.f32 %v2334_v27  ;;  %v3310_v14 = vmul.f32 -1.442695, %v2334_v27 }
0x11c0   :  { %v3742_v29 = vpop.f32.mrb[12].mxu0 }
0x11c1   :  { %v4025_v7 = vadd.f32 %v4823_v58, %v3742_v29  ;;  %v2456_v30 = vpop.f32.mrb[13].mxu0 }
0x11c2   :  { %v4026_v3 = vadd.f32 %v4823_v58, %v2456_v30 }
0x11c3   :  { %4248 = vtanh.f32 %v4025_v7  ;;  %v3318_v34 = vmul.f32 -1.442695, %v4025_v7 }
0x11c4   :  { %4250 = vtanh.f32 %v4026_v3  ;;  %v3317_v35 = vmul.f32 -1.442695, %v4026_v3 }
0x11c5   :  { %v4245_v12 = vpop.eup %4244  ;;  %4252 = vpow2.f32 %v3311_v10 }
0x11c6   :  { %v4247_v47 = vpop.eup %4246  ;;  %2356 = vrot.lane.b32.xlu1 %v4245_v12, %s4374_s0  ;;  %4254 = vpow2.f32 %v3310_v14 }
0x11c7   :  { %2354 = vrot.lane.b32.xlu0 %v4247_v47, %s4374_s0  ;;  %4256 = vpow2.f32 %v3318_v34 }
0x11c8   :  { %4258 = vpow2.f32 %v3317_v35 }
0x11cd   :  { %v4249_v33 = vpop.eup %4248 }
0x11ce   :  { %v4251_v13 = vpop.eup %4250  ;;  %2574 = vrot.lane.b32.xlu1 %v4249_v33, %s4374_s0 }
0x11cf   :  { %2572 = vrot.lane.b32.xlu0 %v4251_v13, %s4374_s0  ;;  %v4253_v37 = vpop.eup %4252 }
0x11d0   :  { %v4255_v39 = vpop.eup %4254  ;;  %v2343_v40 = vadd.f32 1.0, %v4253_v37 }
0x11d1   :  { %v2342_v42 = vadd.f32 1.0, %v4255_v39  ;;  %v4257_v23 = vpop.eup %4256 }
0x11d2   :  { %4260 = vrcp.f32 %v2343_v40  ;;  %v4259_v25 = vpop.eup %4258  ;;  %v2561_v46 = vadd.f32 1.0, %v4257_v23 }
0x11d3   :  { %4262 = vrcp.f32 %v2342_v42  ;;  %v2560_v32 = vadd.f32 1.0, %v4259_v25 }
0x11d4   :  { %4264 = vrcp.f32 %v2561_v46 }
0x11d5   :  { %4266 = vrcp.f32 %v2560_v32 }
0x11dc   :  { %v4261_v48 = vpop.eup %4260 }
0x11dd   :  { %v4263_v28 = vpop.eup %4262  ;;  %v2351_v6 = vmul.f32 %v4261_v48, %v4837_v31 }
0x11de   :  { %v4265_v57 = vpop.eup %4264  ;;  %v2350_v41 = vmul.f32 %v4263_v28, %v4839_v53 }
0x11df   :  { %v4267_v36 = vpop.eup %4266  ;;  %v2569_v51 = vmul.f32 %v4265_v57, %v4845_v1 }
0x11e0   :  { %v2568_v60 = vmul.f32 %v4267_v36, %v4847_v2  ;;  %v2385_v2 = vstv %s3312_s7 }
0x1238   :  { %v2357_v5 = vpop.permute.xlu1 %2356 }
0x1239   :  { %v2361_v49 = vmul.f32 %v4261_v48, %v2357_v5  ;;  %v2355_v52 = vpop.permute.xlu0 %2354 }
0x123a   :  { %v2360_v55 = vmul.f32 %v4263_v28, %v2355_v52 }
0x123b   :  { %2366 = vrot.lane.b32.xlu1 %v2361_v49, %s4374_s0 }
0x123c   :  { %2364 = vrot.lane.b32.xlu0 %v2360_v55, %s4374_s0 }
0x1240   :  { %v2575_v62 = vpop.permute.xlu1 %2574 }
0x1241   :  { %v2579_v38 = vmul.f32 %v4265_v57, %v2575_v62  ;;  %v2573_v4 = vpop.permute.xlu0 %2572 }
0x1242   :  { %v2578_v43 = vmul.f32 %v4267_v36, %v2573_v4 }
0x1243   :  { %2584 = vrot.lane.b32.xlu1 %v2579_v38, %s4374_s0 }
0x1244   :  { %2582 = vrot.lane.b32.xlu0 %v2578_v43, %s4374_s0 }
0x12ad   :  { %v2367_v45 = vpop.permute.xlu1 %2366 }
0x12ae   :  { %v4901_v9 = vadd.f32 %v2367_v45, %v2351_v6  ;;  %v2365_v44 = vpop.permute.xlu0 %2364 }
0x12af   :  { %v4903_v11 = vadd.f32 %v2365_v44, %v2350_v41 }
0x12b0   :  { %4268 = vtanh.f32 %v4901_v9 }
0x12b1   :  { %4270 = vtanh.f32 %v4903_v11 }
0x12b5   :  { %v2585_v26 = vpop.permute.xlu1 %2584 }
0x12b6   :  { %v4909_v16 = vadd.f32 %v2585_v26, %v2569_v51  ;;  %v2583_v31 = vpop.permute.xlu0 %2582 }
0x12b7   :  { %v4911_v63 = vadd.f32 %v2583_v31, %v2568_v60 }
0x12b8   :  { %4272 = vtanh.f32 %v4909_v16 }
0x12b9   :  { %4274 = vtanh.f32 %v4911_v63 }
0x12ba   :  { %v4269_v53 = vpop.eup %4268 }
0x12bb   :  { %v4271_v18 = vpop.eup %4270  ;;  %2378 = vrot.lane.b32.xlu1 %v4269_v53, %s4374_s0 }
0x12bc   :  { %2376 = vrot.lane.b32.xlu0 %v4271_v18, %s4374_s0 }
0x12c2   :  { %v4273_v8 = vpop.eup %4272 }
0x12c3   :  { %v4275_v1 = vpop.eup %4274  ;;  %2596 = vrot.lane.b32.xlu1 %v4273_v8, %s4374_s0 }
0x12c4   :  { %2594 = vrot.lane.b32.xlu0 %v4275_v1, %s4374_s0 }
0x132d   :  { %v2379_v19 = vpop.permute.xlu1 %2378 }
0x132e   :  { %v2383_v61 = vmul.f32 %v4261_v48, %v2379_v19  ;;  %v2377_v50 = vpop.permute.xlu0 %2376 }
0x132f   :  { %v2382_v20 = vmul.f32 %v4263_v28, %v2377_v50 }
0x1330   :  { %v2387_v22 = vmul.f32 %v2385_v2, %v2383_v61  ;;  %2469 = vrot.lane.b32.xlu1 %v2383_v61, %s4375_s22 }
0x1331   :  { %v2386_v24 = vmul.f32 %v2385_v2, %v2382_v20  ;;  %2467 = vrot.lane.b32.xlu0 %v2382_v20, %s4375_s22 }
0x1332   :  { %v4922_v27 = vadd.f32 %v2387_v22, %v4858_v15 }
0x1333   :  { %v4925_v29 = vadd.f32 %v2386_v24, %v4861_v17 }
0x1335   :  { %v2597_v7 = vpop.permute.xlu1 %2596 }
0x1336   :  { %v2601_v30 = vmul.f32 %v4265_v57, %v2597_v7  ;;  %v2595_v3 = vpop.permute.xlu0 %2594 }
0x1337   :  { %v2600_v12 = vmul.f32 %v4267_v36, %v2595_v3  ;;  %v2738_v3 = vstv %s3323_s8 }
0x1338   :  { %2606 = vrot.lane.b32.xlu1 %v2601_v30, %s4375_s22 }
0x1339   :  { %2604 = vrot.lane.b32.xlu0 %v2600_v12, %s4375_s22 }
0x13a2   :  { %v2470_v33 = vpop.permute.xlu1 %2469 }
0x13a3   :  { %v2468_v47 = vpop.permute.xlu0 %2467 }
0x13a4   :  { %3751 = vmatprep.mubr.msk.f32.mxu1 %vm274_vm1, %v2468_v47 }
0x13a5   :  { %3752 = vmatmul.mubr.msk.f32.vlgmr.msra.gmra.mrb[10].mxu1 %vm274_vm1, %v2470_v33 }
0x13a6   :  { %3976 = vmatpush3.bf16.msra.mxu1 %v4542_v59 }
0x13a7   :  { %3978 = vmatprep.subr.bf16.mxu1 %v4556_v0 }
0x13aa   :  { %3980 = vmatpush3.bf16.msra.mxu1 %v4556_v0  ;;  %v2607_v17 = vpop.permute.xlu1 %2606 }
0x13ab   :  { %v2605_v15 = vpop.permute.xlu0 %2604  ;;  %3990 = vmatprep.subr.bf16.mxu1 %v4526_v54 }
0x13ac   :  { %3762 = vmatprep.mubr.msk.f32.mxu1 %vm274_vm1, %v2605_v15  ;;  %3773 = vmatprep.mubr.msk.f32.mxu0 %vm274_vm1, %v2605_v15 }
0x13ad   :  { %3774 = vmatmul.mubr.msk.f32.vlgmr.msra.gmra.mrb[14].mxu0 %vm274_vm1, %v2607_v17  ;;  %3763 = vmatmul.mubr.msk.f32.vlgmr.msra.gmra.mrb[10].mxu1 %vm274_vm1, %v2607_v17 }
0x13ae   :  { %3992 = vmatpush3.bf16.msra.mxu1 %v4526_v54 }
0x13af   :  { %3994 = vmatprep.subr.bf16.mxu1 %v4531_v56 }
0x13b2   :  { %3996 = vmatpush3.bf16.msra.mxu1 %v4531_v56 }
0x13b3   :  { %3998 = vmatprep.subr.bf16.mxu1 %v4542_v59 }
0x1480   :  { %v3775_v13 = vpop.f32.mrb[14].mxu0  ;;  %v3764_v10 = vpop.f32.mrb[10].mxu1 }
0x1481   :  { %v2688_v14 = vadd.f32 %v4885_v21, %v3764_v10  ;;  %v2809_v34 = vpop.f32.mrb[15].mxu0  ;;  %v2678_v35 = vpop.f32.mrb[11].mxu1  ;;  %v4027_v37 = vadd.f32 %v4823_v58, %v3775_v13 }
0x1482   :  { %v2687_v39 = vadd.f32 %v4885_v21, %v2678_v35  ;;  %v4028_v54 = vadd.f32 %v4823_v58, %v2809_v34 }
0x1483   :  { %4276 = vtanh.f32 %v2688_v14  ;;  %v3322_v25 = vmul.f32 -1.442695, %v2688_v14  ;;  %v3329_v46 = vmul.f32 -1.442695, %v4027_v37 }
0x1484   :  { %4278 = vtanh.f32 %v4027_v37  ;;  %v3321_v32 = vmul.f32 -1.442695, %v2687_v39  ;;  %v3328_v58 = vmul.f32 -1.442695, %v4028_v54 }
0x1485   :  { %4280 = vtanh.f32 %v2687_v39 }
0x1486   :  { %4282 = vtanh.f32 %v4028_v54 }
0x1487   :  { %4284 = vpow2.f32 %v3322_v25 }
0x1488   :  { %4286 = vpow2.f32 %v3329_v46 }
0x1489   :  { %4288 = vpow2.f32 %v3321_v32 }
0x148a   :  { %4290 = vpow2.f32 %v3328_v58 }
0x148d   :  { %v4277_v40 = vpop.eup %4276 }
0x148e   :  { %2709 = vrot.lane.b32.xlu1 %v4277_v40, %s4374_s0  ;;  %v4279_v56 = vpop.eup %4278 }
0x148f   :  { %v4281_v42 = vpop.eup %4280 }
0x1490   :  { %2707 = vrot.lane.b32.xlu0 %v4281_v42, %s4374_s0  ;;  %v4283_v23 = vpop.eup %4282 }
0x1491   :  { %v4285_v48 = vpop.eup %4284 }
0x1492   :  { %2927 = vrot.lane.b32.xlu1 %v4279_v56, %s4374_s0  ;;  %v2696_v5 = vadd.f32 1.0, %v4285_v48  ;;  %v4287_v28 = vpop.eup %4286 }
0x1493   :  { %v4289_v49 = vpop.eup %4288  ;;  %v2914_v52 = vadd.f32 1.0, %v4287_v28 }
0x1494   :  { %2925 = vrot.lane.b32.xlu0 %v4283_v23, %s4374_s0  ;;  %4292 = vrcp.f32 %v2696_v5  ;;  %v2695_v55 = vadd.f32 1.0, %v4289_v49  ;;  %v4291_v57 = vpop.eup %4290 }
0x1495   :  { %4294 = vrcp.f32 %v2914_v52  ;;  %v2913_v62 = vadd.f32 1.0, %v4291_v57 }
0x1496   :  { %4296 = vrcp.f32 %v2695_v55 }
0x1497   :  { %4298 = vrcp.f32 %v2913_v62 }
0x149e   :  { %v4293_v36 = vpop.eup %4292 }
0x149f   :  { %v4295_v43 = vpop.eup %4294  ;;  %v2704_v53 = vmul.f32 %v4293_v36, %v4901_v9 }
0x14a0   :  { %v4297_v41 = vpop.eup %4296  ;;  %v2922_v1 = vmul.f32 %v4295_v43, %v4909_v16 }
0x14a1   :  { %v4299_v26 = vpop.eup %4298  ;;  %v2703_v19 = vmul.f32 %v4297_v41, %v4903_v11 }
0x14a2   :  { %v2921_v22 = vmul.f32 %v4299_v26, %v4911_v63 }
0x1500   :  { %v2710_v38 = vpop.permute.xlu1 %2709 }
0x1501   :  { %v2714_v4 = vmul.f32 %v4293_v36, %v2710_v38 }
0x1502   :  { %v2708_v44 = vpop.permute.xlu0 %2707 }
0x1503   :  { %2719 = vrot.lane.b32.xlu1 %v2714_v4, %s4374_s0  ;;  %v2713_v51 = vmul.f32 %v4297_v41, %v2708_v44  ;;  %v3098_v44 = vld [vmem:[%s5035_s1 + $0x90] sm:$0xff] }
0x1504   :  { %v2928_v6 = vpop.permute.xlu1 %2927 }
0x1505   :  { %v2932_v45 = vmul.f32 %v4295_v43, %v2928_v6  ;;  %2717 = vrot.lane.b32.xlu0 %v2713_v51, %s4374_s0 }
0x1506   :  { %v2926_v60 = vpop.permute.xlu0 %2925 }
0x1507   :  { %2937 = vrot.lane.b32.xlu1 %v2932_v45, %s4374_s0  ;;  %v2931_v31 = vmul.f32 %v4299_v26, %v2926_v60  ;;  %v3096_v45 = vld [vmem:[%s5035_s1 + $0x80] sm:$0xff] }
0x1509   :  { %2935 = vrot.lane.b32.xlu0 %v2931_v31, %s4374_s0 }
0x1575   :  { %v2720_v18 = vpop.permute.xlu1 %2719 }
0x1576   :  { %v4956_v8 = vadd.f32 %v2720_v18, %v2704_v53  ;;  %v3091_v18 = vstv %s3334_s17 }
0x1577   :  { %v2718_v50 = vpop.permute.xlu0 %2717 }
0x1578   :  { %4300 = vtanh.f32 %v4956_v8  ;;  %v4961_v20 = vadd.f32 %v2718_v50, %v2703_v19 }
0x1579   :  { %v2938_v2 = vpop.permute.xlu1 %2937 }
0x157a   :  { %v2942_v61 = vadd.f32 %v2938_v2, %v2922_v1 }
0x157b   :  { %v2936_v9 = vpop.permute.xlu0 %2935 }
0x157c   :  { %4302 = vtanh.f32 %v2942_v61  ;;  %v2941_v24 = vadd.f32 %v2936_v9, %v2921_v22 }
0x157d   :  { %4304 = vtanh.f32 %v4961_v20 }
0x157e   :  { %4306 = vtanh.f32 %v2941_v24 }
0x1582   :  { %v4301_v7 = vpop.eup %4300 }
0x1583   :  { %2731 = vrot.lane.b32.xlu1 %v4301_v7, %s4374_s0  ;;  %v3335_v7 = vld [vmem:[%s5035_s1 + $0xa0] ss:$0 sm:$0xff] }
0x1586   :  { %v4303_v30 = vpop.eup %4302 }
0x1587   :  { %2949 = vrot.lane.b32.xlu1 %v4303_v30, %s4374_s0  ;;  %v4305_v16 = vpop.eup %4304 }
0x1588   :  { %2729 = vrot.lane.b32.xlu0 %v4305_v16, %s4374_s0  ;;  %v4307_v11 = vpop.eup %4306 }
0x158c   :  { %2947 = vrot.lane.b32.xlu0 %v4307_v11, %s4374_s0 }
0x15f5   :  { %v2732_v12 = vpop.permute.xlu1 %2731 }
0x15f6   :  { %v2736_v47 = vmul.f32 %v4293_v36, %v2732_v12 }
0x15f8   :  { %v2740_v63 = vmul.f32 %v2738_v3, %v2736_v47  ;;  %2822 = vrot.lane.b32.xlu1 %v2736_v47, %s4375_s22 }
0x15f9   :  { %v2950_v33 = vpop.permute.xlu1 %2949 }
0x15fa   :  { %v4971_v15 = vadd.f32 %v2740_v63, %v4922_v27  ;;  %v2954_v17 = vmul.f32 %v4295_v43, %v2950_v33  ;;  %v2730_v13 = vpop.permute.xlu0 %2729 }
0x15fb   :  { %v2735_v10 = vmul.f32 %v4297_v41, %v2730_v13  ;;  %v3097_v41 = vld [vmem:[%s5035_s1 + $0x88] sm:$0xff] }
0x15fc   :  { %2959 = vrot.lane.b32.xlu1 %v2954_v17, %s4375_s22  ;;  %v4005_v51 = vpack.c.bf16 %v3097_v41, %v3096_v45 }
0x15fd   :  { %v2739_v14 = vmul.f32 %v2738_v3, %v2735_v10  ;;  %2820 = vrot.lane.b32.xlu0 %v2735_v10, %s4375_s22 }
0x15fe   :  { %v2948_v34 = vpop.permute.xlu0 %2947  ;;  %4006 = vmatprep.subr.bf16.mxu0 %v4005_v51 }
0x15ff   :  { %v4976_v35 = vadd.f32 %v2739_v14, %v4925_v29  ;;  %v2953_v37 = vmul.f32 %v4299_v26, %v2948_v34  ;;  %v3099_v26 = vld [vmem:[%s5035_s1 + $0x98] sm:$0xff]  ;;  %4008 = vmatpush3.bf16.msra.mxu0 %v4005_v51  ;;  %s4376_s1 = smov [#allocation6]  }
0x1600   :  { %v4009_v60 = vpack.c.bf16 %v3099_v26, %v3098_v44  ;;  %s3222_s19 = sshll.u32 %s4376_s1, 4  ;;  %s3223_s19 = int_to_ptr.vmem [resolvable:$true] %s3222_s19 }
0x1601   :  { %2957 = vrot.lane.b32.xlu0 %v2953_v37, %s4375_s22  ;;  %s4346_s20 = scalar_lea.vmem %s3223_s19, 256  ;;  %p4351_p6 = scmp.lt.s32.totalorder %s3223_s19, %s3223_s19 }
0x1602   :  { %4010 = vmatprep.subr.bf16.mxu0 %v4009_v60  ;;  %p4347_p5 = scmp.ne.s32.totalorder %s3223_s19, %s4346_s20  ;;  %p4352_p7 = scmp.lt.s32.totalorder %s4346_s20, %s4346_s20 }
0x1603   :  { %4012 = vmatpush3.bf16.msra.mxu0 %v4009_v60 }
0x1604   :  { %p4353_p8 = por %p4352_p7, %p4351_p6 }
0x1606   :  { %p4354_p9 = pnand %p4353_p8, %p4347_p5 }
0x166a   :  { %v2823_v54 = vpop.permute.xlu1 %2822 }
0x166e   :  { %v2960_v29 = vpop.permute.xlu1 %2959 }
0x166f   :  { %v2821_v39 = vpop.permute.xlu0 %2820 }
0x1670   :  { %3784 = vmatprep.mubr.msk.f32.mxu1 %vm274_vm1, %v2821_v39 }
0x1671   :  { %3785 = vmatmul.mubr.msk.f32.vlgmr.msra.gmra.mrb[12].mxu1 %vm274_vm1, %v2823_v54 }
0x1672   :  { %4000 = vmatpush3.bf16.msra.mxu1 %v4542_v59 }
0x1673   :  { %v2958_v27 = vpop.permute.xlu0 %2957  ;;  %4002 = vmatprep.subr.bf16.mxu1 %v4556_v0 }
0x1674   :  { %3795 = vmatprep.mubr.msk.f32.mxu1 %vm274_vm1, %v2958_v27 }
0x1676   :  { %4004 = vmatpush3.bf16.msra.mxu1 %v4556_v0 }
0x1679   :  { %3796 = vmatmul.mubr.msk.f32.vlgmr.msra.gmra.mrb[12].mxu1 %vm274_vm1, %v2960_v29 }
0x174c   :  { %v3797_v40 = vpop.f32.mrb[12].mxu1 }
0x174d   :  { %v3041_v56 = vadd.f32 %v4885_v21, %v3797_v40  ;;  %v3031_v42 = vpop.f32.mrb[13].mxu1 }
0x174e   :  { %v3040_v23 = vadd.f32 %v4885_v21, %v3031_v42 }
0x174f   :  { %4308 = vtanh.f32 %v3041_v56  ;;  %v3333_v46 = vmul.f32 -1.442695, %v3041_v56 }
0x1750   :  { %4310 = vtanh.f32 %v3040_v23  ;;  %v3332_v32 = vmul.f32 -1.442695, %v3040_v23 }
0x1751   :  { %4312 = vpow2.f32 %v3333_v46 }
0x1752   :  { %4314 = vpow2.f32 %v3332_v32 }
0x1759   :  { %v4309_v25 = vpop.eup %4308 }
0x175a   :  { %v4311_v59 = vpop.eup %4310  ;;  %3062 = vrot.lane.b32.xlu1 %v4309_v25, %s4374_s0 }
0x175b   :  { %3060 = vrot.lane.b32.xlu0 %v4311_v59, %s4374_s0  ;;  %v4313_v0 = vpop.eup %4312 }
0x175c   :  { %v4315_v58 = vpop.eup %4314  ;;  %v3049_v48 = vadd.f32 1.0, %v4313_v0 }
0x175d   :  { %v3048_v5 = vadd.f32 1.0, %v4315_v58 }
0x175e   :  { %4316 = vrcp.f32 %v3049_v48 }
0x175f   :  { %4318 = vrcp.f32 %v3048_v5 }
0x1768   :  { %v4317_v28 = vpop.eup %4316 }
0x1769   :  { %v4319_v49 = vpop.eup %4318  ;;  %v3057_v62 = vmul.f32 %v4317_v28, %v4956_v8 }
0x176a   :  { %v3056_v38 = vmul.f32 %v4319_v49, %v4961_v20 }
0x17cc   :  { %v3063_v21 = vpop.permute.xlu1 %3062 }
0x17cd   :  { %v3067_v52 = vmul.f32 %v4317_v28, %v3063_v21  ;;  %v3061_v55 = vpop.permute.xlu0 %3060 }
0x17ce   :  { %v3066_v57 = vmul.f32 %v4319_v49, %v3061_v55 }
0x17cf   :  { %3072 = vrot.lane.b32.xlu1 %v3067_v52, %s4374_s0 }
0x17d0   :  { %3070 = vrot.lane.b32.xlu0 %v3066_v57, %s4374_s0 }
0x1841   :  { %v3073_v36 = vpop.permute.xlu1 %3072 }
0x1842   :  { %v3077_v4 = vadd.f32 %v3073_v36, %v3057_v62  ;;  %v3071_v43 = vpop.permute.xlu0 %3070 }
0x1843   :  { %v3076_v6 = vadd.f32 %v3071_v43, %v3056_v38 }
0x1844   :  { %4320 = vtanh.f32 %v3077_v4 }
0x1845   :  { %4322 = vtanh.f32 %v3076_v6 }
0x184e   :  { %v4321_v31 = vpop.eup %4320 }
0x184f   :  { %v4323_v53 = vpop.eup %4322  ;;  %3084 = vrot.lane.b32.xlu1 %v4321_v31, %s4374_s0 }
0x1850   :  { %3082 = vrot.lane.b32.xlu0 %v4323_v53, %s4374_s0 }
0x18c1   :  { %v3085_v8 = vpop.permute.xlu1 %3084 }
0x18c2   :  { %v3089_v1 = vmul.f32 %v4317_v28, %v3085_v8  ;;  %v3083_v2 = vpop.permute.xlu0 %3082 }
0x18c3   :  { %v3088_v19 = vmul.f32 %v4319_v49, %v3083_v2 }
0x18c4   :  { %v3093_v61 = vmul.f32 %v3091_v18, %v3089_v1 }
0x18c5   :  { %v3092_v50 = vmul.f32 %v3091_v18, %v3088_v19 }
0x18c6   :  { %v3095_v20 = vadd.f32 %v3093_v61, %v4971_v15 }
0x18c7   :  { %v3094_v22 = vadd.f32 %v3092_v50, %v4976_v35 }
0x18c8   :  { %3109 = vrot.lane.b32.xlu1 %v3095_v20, %s4375_s22 }
0x18c9   :  { %3107 = vrot.lane.b32.xlu0 %v3094_v22, %s4375_s22 }
0x193a   :  { %v3110_v24 = vpop.permute.xlu1 %3109 }
0x193b   :  { %v3108_v9 = vpop.permute.xlu0 %3107 }
0x193c   :  { %3806 = vmatprep.mubr.msk.f32.mxu0 %vm274_vm1, %v3108_v9 }
0x193d   :  { %3807 = vmatmul.mubr.msk.f32.vlgmr.msra.gmra.mrb[18].mxu0 %vm274_vm1, %v3110_v24 }
0x1a10   :  { %v3808_v30 = vpop.f32.mrb[18].mxu0 }
0x1a11   :  { %v3187_v16 = vadd.f32 %v3808_v30, %v3335_v7  ;;  %v3181_v11 = vpop.f32.mrb[19].mxu0 }
0x1a12   :  { %v3182_v3 = vadd.f32 %v3335_v7, %v3181_v11 }
0x1a13   :  { %v3193_v12 = vsel %vm64_vm0, %v3187_v16, -inf }
0x1a14   :  { %3194 = vmax.xlane.f32.xlu1 %v3193_v12  ;;  %v3190_v47 = vsel %vm64_vm0, %v3182_v3, -inf }
0x1a15   :  { %3191 = vmax.xlane.f32.xlu0 %v3190_v47 }
0x1aa1   :  { %v3195_v63 = vpop.xlane.xlu1 %3194 }
0x1aa2   :  { %v3197_v33 = vsub.f32 %v3187_v16, %v3195_v63  ;;  %v3192_v15 = vpop.xlane.xlu0 %3191 }
0x1aa3   :  { %v3196_v17 = vsub.f32 %v3182_v3, %v3192_v15 }
0x1aa4   :  { %v3200_v13 = vmul.f32 1.442695, %v3197_v33 }
0x1aa5   :  { %v3198_v10 = vmul.f32 1.442695, %v3196_v17 }
0x1aa7   :  { %4324 = vpow2.f32 %v3198_v10 }
0x1aa8   :  { %4326 = vpow2.f32 %v3200_v13 }
0x1ab1   :  { %v4325_v14 = vpop.eup %4324 }
0x1ab2   :  { %v3202_v34 = vsel %vm64_vm0, %v4325_v14, 0.0  ;;  %v4327_v35 = vpop.eup %4326 }
0x1ab3   :  { %3203 = vadd.xlane.f32.xlu0 %v3202_v34  ;;  %v3205_v37 = vsel %vm64_vm0, %v4327_v35, 0.0 }
0x1ab7   :  { %3206 = vadd.xlane.f32.xlu0 %v3205_v37 }
0x1b40   :  { %v3204_v39 = vpop.xlane.xlu0 %3203 }
0x1b41   :  { %4328 = vlog2.f32 %v3204_v39 }
0x1b44   :  { %v3207_v54 = vpop.xlane.xlu0 %3206 }
0x1b45   :  { %4330 = vlog2.f32 %v3207_v54 }
0x1b4b   :  { %v4329_v27 = vpop.eup %4328 }
0x1b4c   :  { %v3209_v29 = vmul.f32 0.6931472, %v4329_v27 }
0x1b4e   :  { %v3212_v40 = vsub.f32 %v3196_v17, %v3209_v29 }
0x1b4f   :  { %v4331_v56 = vpop.eup %4330 }
0x1b50   :  { %3214 = vst.msk [vmem:[#allocation6] sm:$0xff] %vm64_vm0, %v3212_v40  ;;  %v3211_v42 = vmul.f32 0.6931472, %v4331_v56 }
0x1b52   :  { %v3213_v23 = vsub.f32 %v3197_v33, %v3211_v42 }
0x1b54   :  { %3216 = vst.msk [vmem:[#allocation6 + $0x8] sm:$0x3] %vm3215_vm2, %v3213_v23 }
0x1b55   :  { %4357 = shalt.err (!%p4354_p9)
}
0x1b56   :  { %s4358_s22 = scalar_lea.hbm %s5037_s3, 256 }
0x1b57   :  { %p4359_p10 = scmp.ne.s32.totalorder %s5037_s3, %s4358_s22  ;;  %p4362_p11 = scmp.lt.u32.totalorder %s4358_s22, %s5037_s3 }
0x1b59   :  { %p4364_p12 = pnand %p4362_p11, %p4359_p10 }
0x1b5b   :  { %4367 = shalt.err (!%p4364_p12)
}
0x1b5c   :  { %s4377_s27 = smov 128   ;;  %s4378_s28 = smov 8  }
0x1b5d   :  { %3228 = dma.vmem_to_hbm [thread:$0]  %s3223_s19, 256, %s5037_s3, [#allocation4], %s4377_s27, %s4377_s27, %s4378_s28  }
0x1b5e   :  { %4370 = dma.done.wait [#allocation4], 256  }
0x1b5f   :  { %4371 = vsyncadd [#allocation4], 4294967040 }
0x1b60   :  { %3232 = vsyncpa [#allocation4], 1 }
0x1b61   :  { %3233 = vsyncpa [#allocation5], 1 }

</bundles_post_ra>
